<compile_context>
chip_gen: v7x
topology: tpu7x:2x2x1
jax: 0.10.0
libtpu: 0.0.40
codegen_flags: <defaults>
</compile_context>

<pallas_src>
import functools

import jax
import jax.numpy as jnp
from jax.experimental import pallas as pl
from jax.experimental.pallas import tpu as pltpu

# ---------------------------------------------------------------------------
# D2Q9 lattice constants (Hermite basis) and SimulationConfig equivalents.
# ---------------------------------------------------------------------------
Q = 9
E_X = (0, 1, 0, -1, 0, 1, -1, -1, 1)
E_Y = (0, 0, 1, 0, -1, 1, 1, -1, -1)
W_Q = (4.0 / 9.0,) + (1.0 / 9.0,) * 4 + (1.0 / 36.0,) * 4
CS2 = 1.0 / 3.0

# Deterministic, in-script "SimulationConfig":
TAU = 0.7
GRAVITY = (0.0, -1e-4)
ITERATIONS = 1


# ---------------------------------------------------------------------------
# pltpu.roll direction probes (run once at IMPORT time -> never under a trace).
# sign +1: same direction as jnp.roll, -1: reversed, 0: don't use pltpu.roll.
# ---------------------------------------------------------------------------
def _probe_roll_axis(axis):
    try:
        x = jnp.arange(16 * 256, dtype=jnp.float32).reshape(16, 256)

        def probe(x_ref, o_ref):
            o_ref[...] = pltpu.roll(x_ref[...], 1, axis)

        y = pl.pallas_call(
            probe, out_shape=jax.ShapeDtypeStruct((16, 256), jnp.float32))(x)
        y = jax.block_until_ready(y)
        if bool(jnp.array_equal(y, jnp.roll(x, 1, axis=axis))):
            return 1
        if bool(jnp.array_equal(y, jnp.roll(x, -1, axis=axis))):
            return -1
    except Exception:
        pass
    return 0


_ROLL_SIGN = (_probe_roll_axis(0), _probe_roll_axis(1))   # (sublane, lane)


def _vmem_capacity_bytes():
    try:
        cap = int(getattr(pltpu.get_tpu_info(), "vmem_capacity_bytes"))
        if cap > 0:
            return cap
    except Exception:
        pass
    return 64 * 1024 * 1024          # conservative (v7x per-TC) fallback


# ---------------------------------------------------------------------------
# In-kernel helpers.
# ---------------------------------------------------------------------------
def _make_roll(lane_sign, sub_sign):
    """Periodic shift of a 2D (rows, lanes) plane; XLU roll when aligned."""
    def roll2(x, shift, axis):
        size = x.shape[axis]
        shift = shift % size
        if shift == 0:
            return x
        sign = lane_sign if axis == x.ndim - 1 else sub_sign
        if sign != 0 and x.shape[-2] % 8 == 0 and x.shape[-1] % 128 == 0:
            s = shift if sign > 0 else size - shift
            return pltpu.roll(x, s, axis)
        return jnp.roll(x, shift, axis=axis)
    return roll2


def _conserved_moments(f):
    rho = f[0] + f[1] + f[2] + f[3] + f[4] + f[5] + f[6] + f[7] + f[8]
    jx = (f[1] + f[5] + f[8]) - (f[3] + f[6] + f[7])
    jy = (f[2] + f[5] + f[6]) - (f[4] + f[7] + f[8])
    return rho, jx, jy


def _lbm_full_step(f, w, roll2):
    """One full LBM iteration (streaming + Hermite moment-space collision).

    Collision uses the exact Hermite completeness identity R(M(f)) == f, so
    only conserved moments of f are needed:  f' = (1-1/tau) f + (1/tau) W_q R(eq).
    """
    # handle_boundaries(): periodic domain -> no-op.
    # TODO(synk): SimulationConfig boundary handling (e.g. bounce-back walls)
    # is not given in the reference snippet; periodic boundaries are assumed.
    f = [roll2(roll2(f[q], E_Y[q], 0), E_X[q], 1) for q in range(Q)]

    rho, jx, jy = _conserved_moments(f)
    inv_rho = pl.reciprocal(rho, approx=True)         # EUP slot
    inv_rho = inv_rho * (2.0 - rho * inv_rho)         # one Newton refinement
    vx = jx * inv_rho
    vy = jy * inv_rho

    gx, gy = GRAVITY
    ux = vx if gx == 0.0 else vx + (TAU * gx) * rho
    uy = vy if gy == 0.0 else vy + (TAU * gy) * rho
    rux = rho * ux
    ruy = rho * uy
    ruxux = rux * ux
    ruyuy = ruy * uy
    ruxuy = rux * uy

    # CSE'd reconstruction planes shared by all nine directions.
    cx = 3.0 * rux                                # jx_eq  / cs2
    cy = 3.0 * ruy                                # jy_eq  / cs2
    cxx = 4.5 * (w[0] * ruxux)                    # pxx_eq / (2 cs4)
    cyy = 4.5 * (w[1] * ruyuy)                    # pyy_eq / (2 cs4)
    cxy = 9.0 * (w[2] * ruxuy)                    # pxy_eq / cs4
    cgx = 13.5 * (w[3] * (ruxuy * uy))            # gmx_eq / (2 cs6)
    cgy = 13.5 * (w[4] * (ruxux * uy))            # gmy_eq / (2 cs6)
    cg = 20.25 * (w[5] * (ruxux * (uy * uy)))     # gm_eq  / (4 cs8)

    om = 1.0 / TAU
    keep = 1.0 - om
    new_f = []
    for q in range(Q):
        ex, ey = float(E_X[q]), float(E_Y[q])
        h2x, h2y = ex * ex - CS2, ey * ey - CS2
        feq = rho
        if ex != 0.0:
            feq = feq + cx if ex > 0 else feq - cx
        if ey != 0.0:
            feq = feq + cy if ey > 0 else feq - cy
        feq = feq + h2x * cxx + h2y * cyy
        if ex != 0.0 and ey != 0.0:
            feq = feq + cxy if ex * ey > 0 else feq - cxy
        if ex != 0.0:
            feq = feq + (ex * h2y) * cgx
        if ey != 0.0:
            feq = feq + (h2x * ey) * cgy
        feq = feq + (h2x * h2y) * cg
        new_f.append(keep * f[q] + (om * W_Q[q]) * feq)
    return new_f


def _final_moments_periodic(f, roll2):
    """Streamed conserved moments (rho, jx, jy) with periodic wrap.

    Uses per-group sums so only 6 lane rolls + 4 sublane rolls are needed
    (instead of 9 fully-streamed populations).
    """
    tx = [roll2(f[q], E_X[q], 1) for q in range(Q)]
    a0 = tx[0] + tx[1] + tx[3]
    ap = tx[2] + tx[5] + tx[6]
    am = tx[4] + tx[7] + tx[8]
    b0 = tx[1] - tx[3]
    bp = tx[5] - tx[6]
    bm = tx[8] - tx[7]
    ap_s = roll2(ap, 1, 0)
    am_s = roll2(am, -1, 0)
    bp_s = roll2(bp, 1, 0)
    bm_s = roll2(bm, -1, 0)
    rho = a0 + ap_s + am_s
    jx = b0 + bp_s + bm_s
    jy = ap_s - am_s
    return rho, jx, jy


def _final_moments_tiled(tile, top_last, bot_first, roll2):
    """Streamed conserved moments on a row tile, boundary rows from halos."""
    ht, width = tile[0].shape
    tx = [roll2(tile[q], E_X[q], 1) for q in range(Q)]
    a0 = tx[0] + tx[1] + tx[3]
    ap = tx[2] + tx[5] + tx[6]
    am = tx[4] + tx[7] + tx[8]
    b0 = tx[1] - tx[3]
    bp = tx[5] - tx[6]
    bm = tx[8] - tx[7]

    # x-rolled halo boundary rows (single rows: cheap jnp.roll fallback path).
    t5 = roll2(top_last[5], 1, 1)
    t6 = roll2(top_last[6], -1, 1)
    b7 = roll2(bot_first[7], -1, 1)
    b8 = roll2(bot_first[8], 1, 1)
    hap = top_last[2] + t5 + t6
    ham = bot_first[4] + b7 + b8
    hbp = t5 - t6
    hbm = b8 - b7

    row = jax.lax.broadcasted_iota(jnp.int32, (ht, width), 0)
    first = row == 0
    last = row == (ht - 1)
    ap_s = jnp.where(first, jnp.broadcast_to(hap, (ht, width)), roll2(ap, 1, 0))
    am_s = jnp.where(last, jnp.broadcast_to(ham, (ht, width)), roll2(am, -1, 0))
    bp_s = jnp.where(first, jnp.broadcast_to(hbp, (ht, width)), roll2(bp, 1, 0))
    bm_s = jnp.where(last, jnp.broadcast_to(hbm, (ht, width)), roll2(bm, -1, 0))

    rho = a0 + ap_s + am_s
    jx = b0 + bp_s + bm_s
    jy = ap_s - am_s
    return rho, jx, jy


def _apply_gravity(rho, jx, jy):
    """Last-iteration conserved-moment update: j' = j + g * rho^2."""
    gx, gy = GRAVITY
    if gx != 0.0 or gy != 0.0:
        rho2 = rho * rho
        if gx != 0.0:
            jx = jx + gx * rho2
        if gy != 0.0:
            jy = jy + gy * rho2
    return jx, jy


# ---------------------------------------------------------------------------
# Pallas kernels.
# ---------------------------------------------------------------------------
def _lbm_kernel_tiled(w_ref, f_ref, top_ref, bot_ref, out_ref, *,
                      iterations, halo, lane_sign, sub_sign):
    # w_ref: (6,) SMEM.  f_ref: (1, Q, ht, W).  top/bot_ref: (1, Q, halo, W).
    # out_ref: (1, 3, ht, W).
    roll2 = _make_roll(lane_sign, sub_sign)
    ht = f_ref.shape[2]

    if iterations == 1:
        # Fast path: moment-only step directly on the tile + 1 halo boundary
        # row per side (no slab concatenation, no collision reconstruction).
        tile = [f_ref[0, q].astype(jnp.float32) for q in range(Q)]
        top_last = {}
        for q in (2, 5, 6):
            top_last[q] = top_ref[0, q].astype(jnp.float32)[halo - 1:halo]
        bot_first = {}
        for q in (4, 7, 8):
            bot_first[q] = bot_ref[0, q].astype(jnp.float32)[0:1]
        rho, jx, jy = _final_moments_tiled(tile, top_last, bot_first, roll2)
    else:
        # General path: padded slab [top halo | tile | bottom halo], run
        # (iterations-1) full steps then the moment-only final step; interior
        # rows [halo, halo+ht) stay exact (stencil reach <= iterations <= halo).
        w = [w_ref[i] for i in range(6)]
        slab = [jnp.concatenate(
                    [top_ref[0, q].astype(jnp.float32),
                     f_ref[0, q].astype(jnp.float32),
                     bot_ref[0, q].astype(jnp.float32)], axis=0)
                for q in range(Q)]
        for _ in range(iterations - 1):
            slab = _lbm_full_step(slab, w, roll2)
        rho, jx, jy = _final_moments_periodic(slab, roll2)
        rho = rho[halo:halo + ht]
        jx = jx[halo:halo + ht]
        jy = jy[halo:halo + ht]

    jx, jy = _apply_gravity(rho, jx, jy)
    out_ref[0, 0] = rho
    out_ref[0, 1] = jx
    out_ref[0, 2] = jy


def _lbm_kernel_whole(w_ref, f_ref, out_ref, *, iterations, lane_sign, sub_sign):
    # Fallback: whole lattice per block (H not aligned to the halo unit).
    # TODO(synk): very large unaligned lattices could exceed VMEM here; the
    # aligned tiled path above is the supported large-lattice route.
    roll2 = _make_roll(lane_sign, sub_sign)
    w = [w_ref[i] for i in range(6)]
    f = [f_ref[0, q].astype(jnp.float32) for q in range(Q)]
    for _ in range(iterations - 1):
        f = _lbm_full_step(f, w, roll2)
    rho, jx, jy = _final_moments_periodic(f, roll2)
    jx, jy = _apply_gravity(rho, jx, jy)
    out_ref[0, 0] = rho
    out_ref[0, 1] = jx
    out_ref[0, 2] = jy


# ---------------------------------------------------------------------------
# Tile-size selection (VMEM footprint + grid-granularity aware).
# ---------------------------------------------------------------------------
def _choose_row_tile(B, H, W, halo, iterations, isize, capacity):
    if halo > H or H % halo != 0:
        return None
    cands = [d for d in range(halo, H + 1, halo) if H % d == 0]
    if not cands:
        return None
    w_pad = -(-max(W, 128) // 128) * 128
    budget = max(int(0.40 * capacity), 8 * 1024 * 1024)

    def footprint(ht):
        io = (2 * Q * ht * w_pad * isize            # tile input, double-buffered
              + 2 * 2 * Q * halo * w_pad * isize    # two halo inputs, double-buffered
              + 2 * 3 * ht * w_pad * 4)             # output, double-buffered
        if iterations == 1:
            tmp = 16 * ht * w_pad * 4               # live f32 planes (moment path)
        else:
            tmp = (Q + 28) * (ht + 2 * halo) * w_pad * 4   # slab + step temporaries
        return io + tmp

    fitting = [d for d in cands if footprint(d) <= budget]
    if not fitting:
        return cands[0]
    if B >= 4:                      # batch already feeds megacore / pipeline
        return fitting[-1]
    # Prefer >=4 grid steps if halo-read overhead stays <= 12.5%,
    # else >=2 grid steps with overhead <= 25%, else the biggest tile.
    good = [d for d in fitting if B * (H // d) >= 4 and d >= 16 * halo]
    if good:
        return good[-1]
    ok = [d for d in fitting if B * (H // d) >= 2 and d >= 8 * halo]
    if ok:
        return ok[-1]
    return fitting[-1]


# ---------------------------------------------------------------------------
# Wrapper.
# ---------------------------------------------------------------------------
def lbm_hermite_forward(weight, f_in, *, dist_layout="hwq", iterations=ITERATIONS):
    """Pallas implementation of LBMHermiteMinimalLayer.forward.

    dist_layout="hwq": torch-module layout (B, H, W, Q) or (H, W, Q); a single
        layout change to (B, Q, H, W) is done here.
    dist_layout="qhw": native kernel layout (B, Q, H, W) or (Q, H, W); no
        host-side transpose, W stays on the TPU lane axis.
    """
    assert iterations >= 1
    batched = f_in.ndim == 4
    if not batched:
        f_in = f_in[None]
    if dist_layout == "hwq":
        f = jnp.transpose(f_in, (0, 3, 1, 2))       # one-time layout change
    elif dist_layout == "qhw":
        f = f_in
    else:
        raise ValueError(f"unknown dist_layout: {dist_layout!r}")
    B, q, H, W = f.shape
    assert q == Q, f"expected {Q} lattice directions, got {q}"
    weight = weight.astype(jnp.float32)

    isize = f.dtype.itemsize
    sub = 8 * max(1, 4 // isize)                    # sublane pack (8 f32 / 16 bf16)
    halo = sub * (-(-iterations // sub))            # halo rows >= iterations

    capacity = _vmem_capacity_bytes()
    vmem_limit = min(int(0.72 * capacity), 100 * 1024 * 1024)
    sub_sign, lane_sign = _ROLL_SIGN

    weight_spec = pl.BlockSpec(memory_space=pltpu.MemorySpace.SMEM)
    out_shape = jax.ShapeDtypeStruct((B, 3, H, W), jnp.float32)

    ht = _choose_row_tile(B, H, W, halo, iterations, isize, capacity)

    if ht is None:
        kernel = functools.partial(
            _lbm_kernel_whole, iterations=iterations,
            lane_sign=lane_sign, sub_sign=sub_sign)
        out = pl.pallas_call(
            kernel,
            out_shape=out_shape,
            grid=(B,),
            in_specs=[weight_spec,
                      pl.BlockSpec((1, Q, H, W), lambda b: (b, 0, 0, 0))],
            out_specs=pl.BlockSpec((1, 3, H, W), lambda b: (b, 0, 0, 0)),
            compiler_params=pltpu.CompilerParams(
                dimension_semantics=("parallel",),
                vmem_limit_bytes=vmem_limit),
        )(weight, f)
    else:
        nb = ht // halo           # halo blocks per row tile
        nhb = H // halo           # halo blocks in the whole lattice
        kernel = functools.partial(
            _lbm_kernel_tiled, iterations=iterations, halo=halo,
            lane_sign=lane_sign, sub_sign=sub_sign)
        out = pl.pallas_call(
            kernel,
            out_shape=out_shape,
            grid=(B, H // ht),
            in_specs=[
                weight_spec,
                # main row tile
                pl.BlockSpec((1, Q, ht, W), lambda b, i: (b, 0, i, 0)),
                # top halo block: lattice rows [i*ht - halo, i*ht) (periodic)
                pl.BlockSpec((1, Q, halo, W),
                             lambda b, i: (b, 0, (i * nb + nhb - 1) % nhb, 0)),
                # bottom halo block: rows [(i+1)*ht, (i+1)*ht + halo) (periodic)
                pl.BlockSpec((1, Q, halo, W),
                             lambda b, i: (b, 0, ((i + 1) * nb) % nhb, 0)),
            ],
            out_specs=pl.BlockSpec((1, 3, ht, W), lambda b, i: (b, 0, i, 0)),
            compiler_params=pltpu.CompilerParams(
                dimension_semantics=("parallel", "parallel"),
                vmem_limit_bytes=vmem_limit),
        )(weight, f, f, f)
    return out if batched else out[0]


# ---------------------------------------------------------------------------
# Pure-JAX reference (original full 9-moment Hermite collision) for checking.
# ---------------------------------------------------------------------------
def _hermite_moments_ref(f):
    def msum(coeff_fn):
        acc = None
        for q in range(Q):
            c = coeff_fn(q)
            if c == 0.0:
                continue
            term = f[q] if c == 1.0 else c * f[q]
            acc = term if acc is None else acc + term
        return acc

    h2x = [E_X[q] * E_X[q] - CS2 for q in range(Q)]
    h2y = [E_Y[q] * E_Y[q] - CS2 for q in range(Q)]
    return dict(
        rho=msum(lambda q: 1.0),
        jx=msum(lambda q: float(E_X[q])),
        jy=msum(lambda q: float(E_Y[q])),
        pxx=msum(lambda q: h2x[q]),
        pyy=msum(lambda q: h2y[q]),
        pxy=msum(lambda q: float(E_X[q] * E_Y[q])),
        gmx=msum(lambda q: float(E_X[q]) * h2y[q]),
        gmy=msum(lambda q: h2x[q] * float(E_Y[q])),
        gm=msum(lambda q: h2x[q] * h2y[q]),
    )


def _lbm_step_ref(f, weight, roll_axes):
    f = [jnp.roll(f[q], (E_Y[q], E_X[q]), axis=roll_axes) for q in range(Q)]
    m = _hermite_moments_ref(f)
    rho, jx, jy = m["rho"], m["jx"], m["jy"]
    vx = jx / rho
    vy = jy / rho
    gx, gy = GRAVITY
    ux = vx + TAU * gx * rho
    uy = vy + TAU * gy * rho
    eq = dict(
        rho=rho,
        jx=rho * ux,
        jy=rho * uy,
        pxx=weight[0] * rho * ux * ux,
        pyy=weight[1] * rho * uy * uy,
        pxy=weight[2] * rho * ux * uy,
        gmx=weight[3] * rho * ux * uy * uy,
        gmy=weight[4] * rho * ux * ux * uy,
        gm=weight[5] * rho * ux * ux * uy * uy,
    )
    om = 1.0 / TAU
    post = {k: m[k] + om * (eq[k] - m[k]) for k in m}
    inv_cs2 = 1.0 / CS2
    inv_cs4 = 1.0 / (CS2 * CS2)
    inv_2cs4 = 0.5 * inv_cs4
    inv_2cs6 = 1.0 / (2.0 * CS2 ** 3)
    inv_4cs8 = 1.0 / (4.0 * CS2 ** 4)
    new_f = []
    for q in range(Q):
        ex, ey = float(E_X[q]), float(E_Y[q])
        h2xx, h2yy, h2xy = ex * ex - CS2, ey * ey - CS2, ex * ey
        fq = post["rho"]
        fq = fq + (ex * inv_cs2) * post["jx"] + (ey * inv_cs2) * post["jy"]
        fq = (fq + (h2xx * inv_2cs4) * post["pxx"]
              + (h2yy * inv_2cs4) * post["pyy"]
              + (h2xy * inv_cs4) * post["pxy"])
        fq = (fq + (ex * h2yy * inv_2cs6) * post["gmx"]
              + (h2xx * ey * inv_2cs6) * post["gmy"])
        fq = fq + (h2xx * h2yy * inv_4cs8) * post["gm"]
        new_f.append(W_Q[q] * fq)
    return new_f


def lbm_hermite_reference(weight, f_in, iterations=ITERATIONS):
    batched = f_in.ndim == 4
    if not batched:
        f_in = f_in[None]
    f_bqhw = jnp.transpose(f_in.astype(jnp.float32), (0, 3, 1, 2))
    f = [f_bqhw[:, q] for q in range(Q)]
    w = [weight[i].astype(jnp.float32) for i in range(6)]
    for _ in range(iterations):
        f = _lbm_step_ref(f, w, roll_axes=(1, 2))
    m = _hermite_moments_ref(f)
    out = jnp.stack([m["rho"], m["jx"], m["jy"]], axis=1)
    return out if batched else out[0]


# ---------------------------------------------------------------------------
# Demo / self-check.
# ---------------------------------------------------------------------------
if __name__ == "__main__":
    key = jax.random.PRNGKey(0)
    kw, kf1, kf2, kf3 = jax.random.split(key, 4)

    # nn.Parameter(torch.randn(6)) -> deterministic normal init.
    weight = jax.random.normal(kw, (6,), dtype=jnp.float32)
    base = jnp.asarray(W_Q, dtype=jnp.float32)

    # Case 1: torch-module layout (B, H, W, Q), small lattice.
    B, H, W = 2, 16, 16
    noise1 = jax.random.normal(kf1, (B, H, W, Q), dtype=jnp.float32)
    f_hwq = base[None, None, None, :] * (1.0 + 0.05 * noise1)
    out1 = jax.block_until_ready(lbm_hermite_forward(weight, f_hwq))
    ref1 = jax.block_until_ready(lbm_hermite_reference(weight, f_hwq))
    assert out1.shape == (B, 3, H, W) and out1.dtype == jnp.float32
    err1 = float(jnp.max(jnp.abs(out1 - ref1)))
    assert err1 < 5e-4, f"case1 kernel/reference mismatch: {err1}"

    # Case 2: native (B, Q, H, W) layout, lane-dense W, multi-tile H grid
    # exercising the periodic halo index maps and the moment-only fast path.
    B2, H2, W2 = 1, 256, 256
    noise2 = jax.random.normal(kf2, (B2, Q, H2, W2), dtype=jnp.float32)
    f_qhw = base[None, :, None, None] * (1.0 + 0.05 * noise2)
    out2 = jax.block_until_ready(
        lbm_hermite_forward(weight, f_qhw, dist_layout="qhw"))
    ref2 = jax.block_until_ready(
        lbm_hermite_reference(weight, jnp.transpose(f_qhw, (0, 2, 3, 1))))
    assert out2.shape == (B2, 3, H2, W2) and out2.dtype == jnp.float32
    err2 = float(jnp.max(jnp.abs(out2 - ref2)))
    assert err2 < 5e-4, f"case2 kernel/reference mismatch: {err2}"

    # Case 3: multiple iterations -> exercises the slab path, the full Hermite
    # collision step and the moment-only final epilogue.
    B3, H3, W3, IT3 = 1, 64, 128, 3
    noise3 = jax.random.normal(kf3, (B3, Q, H3, W3), dtype=jnp.float32)
    f3 = base[None, :, None, None] * (1.0 + 0.05 * noise3)
    out3 = jax.block_until_ready(
        lbm_hermite_forward(weight, f3, dist_layout="qhw", iterations=IT3))
    ref3 = jax.block_until_ready(
        lbm_hermite_reference(weight, jnp.transpose(f3, (0, 2, 3, 1)),
                              iterations=IT3))
    assert out3.shape == (B3, 3, H3, W3)
    err3 = float(jnp.max(jnp.abs(out3 - ref3)))
    assert err3 < 5e-4, f"case3 kernel/reference mismatch: {err3}"

    print("KERNEL_OK")
</pallas_src>

<mosaic_0001>
module attributes {stable_mosaic.version = 11 : i64} {
  func.func @probe(%arg0: memref<16x256xf32, #tpu.memory_space<vmem>>, %arg1: memref<16x256xf32, #tpu.memory_space<vmem>>) attributes {dimension_semantics = [], scalar_prefetch = 0 : i64, scratch_operands = 0 : i64, tpu.core_type = #tpu.core_type<tc>} {
    %c0 = arith.constant 0 : index
    %c0_0 = arith.constant 0 : index
    %0 = vector.load %arg0[%c0, %c0_0] : memref<16x256xf32, #tpu.memory_space<vmem>>, vector<16x256xf32>
    %c1_i32 = arith.constant 1 : i32
    %1 = tpu.dynamic_rotate %0 by %c1_i32 dim 0 : vector<16x256xf32>, i32 -> vector<16x256xf32>
    %c0_1 = arith.constant 0 : index
    %c0_2 = arith.constant 0 : index
    %2 = vector.load %arg1[%c0_1, %c0_2] : memref<16x256xf32, #tpu.memory_space<vmem>>, vector<16x256xf32>
    tpu.vector_store %arg1[%c0_1, %c0_2], %1 {strides = array<i32>} : memref<16x256xf32, #tpu.memory_space<vmem>>, vector<16x256xf32>,
    return
  }
}

module attributes {stable_mosaic.version = 11 : i64} {
  func.func @probe(%arg0: memref<16x256xf32, #tpu.memory_space<vmem>>, %arg1: memref<16x256xf32, #tpu.memory_space<vmem>>) attributes {dimension_semantics = [], scalar_prefetch = 0 : i64, scratch_operands = 0 : i64, tpu.core_type = #tpu.core_type<tc>} {
    %c0 = arith.constant 0 : index
    %c0_0 = arith.constant 0 : index
    %0 = vector.load %arg0[%c0, %c0_0] : memref<16x256xf32, #tpu.memory_space<vmem>>, vector<16x256xf32>
    %c1_i32 = arith.constant 1 : i32
    %1 = tpu.dynamic_rotate %0 by %c1_i32 dim 1 : vector<16x256xf32>, i32 -> vector<16x256xf32>
    %c0_1 = arith.constant 0 : index
    %c0_2 = arith.constant 0 : index
    %2 = vector.load %arg1[%c0_1, %c0_2] : memref<16x256xf32, #tpu.memory_space<vmem>>, vector<16x256xf32>
    tpu.vector_store %arg1[%c0_1, %c0_2], %1 {strides = array<i32>} : memref<16x256xf32, #tpu.memory_space<vmem>>, vector<16x256xf32>,
    return
  }
}

module attributes {stable_mosaic.version = 11 : i64} {
  func.func @_lbm_kernel_tiled(%arg0: i32, %arg1: i32, %arg2: memref<6xf32, #tpu.memory_space<smem>>, %arg3: memref<1x9x16x16xf32, #tpu.memory_space<vmem>>, %arg4: memref<1x9x8x16xf32, #tpu.memory_space<vmem>>, %arg5: memref<1x9x8x16xf32, #tpu.memory_space<vmem>>, %arg6: memref<1x3x16x16xf32, #tpu.memory_space<vmem>>) attributes {dimension_semantics = [#tpu.dimension_semantics<parallel>, #tpu.dimension_semantics<parallel>], iteration_bounds = array<i64: 2, 1>, scalar_prefetch = 0 : i64, scratch_operands = 0 : i64, tpu.core_type = #tpu.core_type<tc>, window_params = [{transform_indices = @transform_0, window_bounds = array<i64: 6>}, {transform_indices = @transform_1, window_bounds = array<i64: 1, 9, 16, 16>}, {transform_indices = @transform_2, window_bounds = array<i64: 1, 9, 8, 16>}, {transform_indices = @transform_3, window_bounds = array<i64: 1, 9, 8, 16>}, {transform_indices = @transform_4, window_bounds = array<i64: 1, 3, 16, 16>}]} {
    %c0 = arith.constant 0 : index
    %c0_0 = arith.constant 0 : index
    %c0_1 = arith.constant 0 : index
    %c0_2 = arith.constant 0 : index
    %0 = vector.load %arg3[%c0, %c0_0, %c0_1, %c0_2] : memref<1x9x16x16xf32, #tpu.memory_space<vmem>>, vector<1x1x16x16xf32>
    %1 = vector.shape_cast %0 : vector<1x1x16x16xf32> to vector<16x16xf32>
    %c0_3 = arith.constant 0 : index
    %c1 = arith.constant 1 : index
    %c0_4 = arith.constant 0 : index
    %c0_5 = arith.constant 0 : index
    %2 = vector.load %arg3[%c0_3, %c1, %c0_4, %c0_5] : memref<1x9x16x16xf32, #tpu.memory_space<vmem>>, vector<1x1x16x16xf32>
    %3 = vector.shape_cast %2 : vector<1x1x16x16xf32> to vector<16x16xf32>
    %c0_6 = arith.constant 0 : index
    %c2 = arith.constant 2 : index
    %c0_7 = arith.constant 0 : index
    %c0_8 = arith.constant 0 : index
    %4 = vector.load %arg3[%c0_6, %c2, %c0_7, %c0_8] : memref<1x9x16x16xf32, #tpu.memory_space<vmem>>, vector<1x1x16x16xf32>
    %5 = vector.shape_cast %4 : vector<1x1x16x16xf32> to vector<16x16xf32>
    %c0_9 = arith.constant 0 : index
    %c3 = arith.constant 3 : index
    %c0_10 = arith.constant 0 : index
    %c0_11 = arith.constant 0 : index
    %6 = vector.load %arg3[%c0_9, %c3, %c0_10, %c0_11] : memref<1x9x16x16xf32, #tpu.memory_space<vmem>>, vector<1x1x16x16xf32>
    %7 = vector.shape_cast %6 : vector<1x1x16x16xf32> to vector<16x16xf32>
    %c0_12 = arith.constant 0 : index
    %c4 = arith.constant 4 : index
    %c0_13 = arith.constant 0 : index
    %c0_14 = arith.constant 0 : index
    %8 = vector.load %arg3[%c0_12, %c4, %c0_13, %c0_14] : memref<1x9x16x16xf32, #tpu.memory_space<vmem>>, vector<1x1x16x16xf32>
    %9 = vector.shape_cast %8 : vector<1x1x16x16xf32> to vector<16x16xf32>
    %c0_15 = arith.constant 0 : index
    %c5 = arith.constant 5 : index
    %c0_16 = arith.constant 0 : index
    %c0_17 = arith.constant 0 : index
    %10 = vector.load %arg3[%c0_15, %c5, %c0_16, %c0_17] : memref<1x9x16x16xf32, #tpu.memory_space<vmem>>, vector<1x1x16x16xf32>
    %11 = vector.shape_cast %10 : vector<1x1x16x16xf32> to vector<16x16xf32>
    %c0_18 = arith.constant 0 : index
    %c6 = arith.constant 6 : index
    %c0_19 = arith.constant 0 : index
    %c0_20 = arith.constant 0 : index
    %12 = vector.load %arg3[%c0_18, %c6, %c0_19, %c0_20] : memref<1x9x16x16xf32, #tpu.memory_space<vmem>>, vector<1x1x16x16xf32>
    %13 = vector.shape_cast %12 : vector<1x1x16x16xf32> to vector<16x16xf32>
    %c0_21 = arith.constant 0 : index
    %c7 = arith.constant 7 : index
    %c0_22 = arith.constant 0 : index
    %c0_23 = arith.constant 0 : index
    %14 = vector.load %arg3[%c0_21, %c7, %c0_22, %c0_23] : memref<1x9x16x16xf32, #tpu.memory_space<vmem>>, vector<1x1x16x16xf32>
    %15 = vector.shape_cast %14 : vector<1x1x16x16xf32> to vector<16x16xf32>
    %c0_24 = arith.constant 0 : index
    %c8 = arith.constant 8 : index
    %c0_25 = arith.constant 0 : index
    %c0_26 = arith.constant 0 : index
    %16 = vector.load %arg3[%c0_24, %c8, %c0_25, %c0_26] : memref<1x9x16x16xf32, #tpu.memory_space<vmem>>, vector<1x1x16x16xf32>
    %17 = vector.shape_cast %16 : vector<1x1x16x16xf32> to vector<16x16xf32>
    %c0_27 = arith.constant 0 : index
    %c2_28 = arith.constant 2 : index
    %c0_29 = arith.constant 0 : index
    %c0_30 = arith.constant 0 : index
    %18 = vector.load %arg4[%c0_27, %c2_28, %c0_29, %c0_30] : memref<1x9x8x16xf32, #tpu.memory_space<vmem>>, vector<1x1x8x16xf32>
    %19 = vector.shape_cast %18 : vector<1x1x8x16xf32> to vector<8x16xf32>
    %20 = vector.extract_strided_slice %19 {offsets = [7, 0], sizes = [1, 16], strides = [1, 1]} : vector<8x16xf32> to vector<1x16xf32>
    %c0_31 = arith.constant 0 : index
    %c5_32 = arith.constant 5 : index
    %c0_33 = arith.constant 0 : index
    %c0_34 = arith.constant 0 : index
    %21 = vector.load %arg4[%c0_31, %c5_32, %c0_33, %c0_34] : memref<1x9x8x16xf32, #tpu.memory_space<vmem>>, vector<1x1x8x16xf32>
    %22 = vector.shape_cast %21 : vector<1x1x8x16xf32> to vector<8x16xf32>
    %23 = vector.extract_strided_slice %22 {offsets = [7, 0], sizes = [1, 16], strides = [1, 1]} : vector<8x16xf32> to vector<1x16xf32>
    %c0_35 = arith.constant 0 : index
    %c6_36 = arith.constant 6 : index
    %c0_37 = arith.constant 0 : index
    %c0_38 = arith.constant 0 : index
    %24 = vector.load %arg4[%c0_35, %c6_36, %c0_37, %c0_38] : memref<1x9x8x16xf32, #tpu.memory_space<vmem>>, vector<1x1x8x16xf32>
    %25 = vector.shape_cast %24 : vector<1x1x8x16xf32> to vector<8x16xf32>
    %26 = vector.extract_strided_slice %25 {offsets = [7, 0], sizes = [1, 16], strides = [1, 1]} : vector<8x16xf32> to vector<1x16xf32>
    %c0_39 = arith.constant 0 : index
    %c4_40 = arith.constant 4 : index
    %c0_41 = arith.constant 0 : index
    %c0_42 = arith.constant 0 : index
    %27 = vector.load %arg5[%c0_39, %c4_40, %c0_41, %c0_42] : memref<1x9x8x16xf32, #tpu.memory_space<vmem>>, vector<1x1x8x16xf32>
    %28 = vector.shape_cast %27 : vector<1x1x8x16xf32> to vector<8x16xf32>
    %29 = vector.extract_strided_slice %28 {offsets = [0, 0], sizes = [1, 16], strides = [1, 1]} : vector<8x16xf32> to vector<1x16xf32>
    %c0_43 = arith.constant 0 : index
    %c7_44 = arith.constant 7 : index
    %c0_45 = arith.constant 0 : index
    %c0_46 = arith.constant 0 : index
    %30 = vector.load %arg5[%c0_43, %c7_44, %c0_45, %c0_46] : memref<1x9x8x16xf32, #tpu.memory_space<vmem>>, vector<1x1x8x16xf32>
    %31 = vector.shape_cast %30 : vector<1x1x8x16xf32> to vector<8x16xf32>
    %32 = vector.extract_strided_slice %31 {offsets = [0, 0], sizes = [1, 16], strides = [1, 1]} : vector<8x16xf32> to vector<1x16xf32>
    %c0_47 = arith.constant 0 : index
    %c8_48 = arith.constant 8 : index
    %c0_49 = arith.constant 0 : index
    %c0_50 = arith.constant 0 : index
    %33 = vector.load %arg5[%c0_47, %c8_48, %c0_49, %c0_50] : memref<1x9x8x16xf32, #tpu.memory_space<vmem>>, vector<1x1x8x16xf32>
    %34 = vector.shape_cast %33 : vector<1x1x8x16xf32> to vector<8x16xf32>
    %35 = vector.extract_strided_slice %34 {offsets = [0, 0], sizes = [1, 16], strides = [1, 1]} : vector<8x16xf32> to vector<1x16xf32>
    %36 = vector.extract_strided_slice %3 {offsets = [0, 15], sizes = [16, 1], strides = [1, 1]} : vector<16x16xf32> to vector<16x1xf32>
    %37 = vector.extract_strided_slice %3 {offsets = [0, 0], sizes = [16, 15], strides = [1, 1]} : vector<16x16xf32> to vector<16x15xf32>
    %38 = tpu.concatenate %36, %37 in 1 : vector<16x1xf32>, vector<16x15xf32> -> vector<16x16xf32>
    %39 = vector.extract_strided_slice %7 {offsets = [0, 1], sizes = [16, 15], strides = [1, 1]} : vector<16x16xf32> to vector<16x15xf32>
    %40 = vector.extract_strided_slice %7 {offsets = [0, 0], sizes = [16, 1], strides = [1, 1]} : vector<16x16xf32> to vector<16x1xf32>
    %41 = tpu.concatenate %39, %40 in 1 : vector<16x15xf32>, vector<16x1xf32> -> vector<16x16xf32>
    %42 = vector.extract_strided_slice %11 {offsets = [0, 15], sizes = [16, 1], strides = [1, 1]} : vector<16x16xf32> to vector<16x1xf32>
    %43 = vector.extract_strided_slice %11 {offsets = [0, 0], sizes = [16, 15], strides = [1, 1]} : vector<16x16xf32> to vector<16x15xf32>
    %44 = tpu.concatenate %42, %43 in 1 : vector<16x1xf32>, vector<16x15xf32> -> vector<16x16xf32>
    %45 = vector.extract_strided_slice %13 {offsets = [0, 1], sizes = [16, 15], strides = [1, 1]} : vector<16x16xf32> to vector<16x15xf32>
    %46 = vector.extract_strided_slice %13 {offsets = [0, 0], sizes = [16, 1], strides = [1, 1]} : vector<16x16xf32> to vector<16x1xf32>
    %47 = tpu.concatenate %45, %46 in 1 : vector<16x15xf32>, vector<16x1xf32> -> vector<16x16xf32>
    %48 = vector.extract_strided_slice %15 {offsets = [0, 1], sizes = [16, 15], strides = [1, 1]} : vector<16x16xf32> to vector<16x15xf32>
    %49 = vector.extract_strided_slice %15 {offsets = [0, 0], sizes = [16, 1], strides = [1, 1]} : vector<16x16xf32> to vector<16x1xf32>
    %50 = tpu.concatenate %48, %49 in 1 : vector<16x15xf32>, vector<16x1xf32> -> vector<16x16xf32>
    %51 = vector.extract_strided_slice %17 {offsets = [0, 15], sizes = [16, 1], strides = [1, 1]} : vector<16x16xf32> to vector<16x1xf32>
    %52 = vector.extract_strided_slice %17 {offsets = [0, 0], sizes = [16, 15], strides = [1, 1]} : vector<16x16xf32> to vector<16x15xf32>
    %53 = tpu.concatenate %51, %52 in 1 : vector<16x1xf32>, vector<16x15xf32> -> vector<16x16xf32>
    %54 = arith.addf %1, %38 : vector<16x16xf32>
    %55 = arith.addf %54, %41 : vector<16x16xf32>
    %56 = arith.addf %5, %44 : vector<16x16xf32>
    %57 = arith.addf %56, %47 : vector<16x16xf32>
    %58 = arith.addf %9, %50 : vector<16x16xf32>
    %59 = arith.addf %58, %53 : vector<16x16xf32>
    %60 = arith.subf %38, %41 : vector<16x16xf32>
    %61 = arith.subf %44, %47 : vector<16x16xf32>
    %62 = arith.subf %53, %50 : vector<16x16xf32>
    %63 = vector.extract_strided_slice %23 {offsets = [0, 15], sizes = [1, 1], strides = [1, 1]} : vector<1x16xf32> to vector<1x1xf32>
    %64 = vector.extract_strided_slice %23 {offsets = [0, 0], sizes = [1, 15], strides = [1, 1]} : vector<1x16xf32> to vector<1x15xf32>
    %65 = tpu.concatenate %63, %64 in 1 : vector<1x1xf32>, vector<1x15xf32> -> vector<1x16xf32>
    %66 = vector.extract_strided_slice %26 {offsets = [0, 1], sizes = [1, 15], strides = [1, 1]} : vector<1x16xf32> to vector<1x15xf32>
    %67 = vector.extract_strided_slice %26 {offsets = [0, 0], sizes = [1, 1], strides = [1, 1]} : vector<1x16xf32> to vector<1x1xf32>
    %68 = tpu.concatenate %66, %67 in 1 : vector<1x15xf32>, vector<1x1xf32> -> vector<1x16xf32>
    %69 = vector.extract_strided_slice %32 {offsets = [0, 1], sizes = [1, 15], strides = [1, 1]} : vector<1x16xf32> to vector<1x15xf32>
    %70 = vector.extract_strided_slice %32 {offsets = [0, 0], sizes = [1, 1], strides = [1, 1]} : vector<1x16xf32> to vector<1x1xf32>
    %71 = tpu.concatenate %69, %70 in 1 : vector<1x15xf32>, vector<1x1xf32> -> vector<1x16xf32>
    %72 = vector.extract_strided_slice %35 {offsets = [0, 15], sizes = [1, 1], strides = [1, 1]} : vector<1x16xf32> to vector<1x1xf32>
    %73 = vector.extract_strided_slice %35 {offsets = [0, 0], sizes = [1, 15], strides = [1, 1]} : vector<1x16xf32> to vector<1x15xf32>
    %74 = tpu.concatenate %72, %73 in 1 : vector<1x1xf32>, vector<1x15xf32> -> vector<1x16xf32>
    %75 = arith.addf %20, %65 : vector<1x16xf32>
    %76 = arith.addf %75, %68 : vector<1x16xf32>
    %77 = arith.addf %29, %71 : vector<1x16xf32>
    %78 = arith.addf %77, %74 : vector<1x16xf32>
    %79 = arith.subf %65, %68 : vector<1x16xf32>
    %80 = arith.subf %74, %71 : vector<1x16xf32>
    %81 = tpu.iota {dimensions = array<i32: 0>} : vector<16x16xi32>
    %c0_i32 = arith.constant 0 : i32
    %82 = vector.broadcast %c0_i32 : i32 to vector<16x16xi32>
    %83 = arith.cmpi eq, %81, %82 : vector<16x16xi32>
    %c15_i32 = arith.constant 15 : i32
    %84 = vector.broadcast %c15_i32 : i32 to vector<16x16xi32>
    %85 = arith.cmpi eq, %81, %84 : vector<16x16xi32>
    %86 = vector.shape_cast %76 : vector<1x16xf32> to vector<1x16xf32>
    %87 = vector.broadcast %86 : vector<1x16xf32> to vector<16x16xf32>
    %88 = vector.extract_strided_slice %57 {offsets = [15, 0], sizes = [1, 16], strides = [1, 1]} : vector<16x16xf32> to vector<1x16xf32>
    %89 = vector.extract_strided_slice %57 {offsets = [0, 0], sizes = [15, 16], strides = [1, 1]} : vector<16x16xf32> to vector<15x16xf32>
    %90 = tpu.concatenate %88, %89 in 0 : vector<1x16xf32>, vector<15x16xf32> -> vector<16x16xf32>
    %91 = arith.select %83, %87, %90 : vector<16x16xi1>, vector<16x16xf32>
    %92 = vector.shape_cast %78 : vector<1x16xf32> to vector<1x16xf32>
    %93 = vector.broadcast %92 : vector<1x16xf32> to vector<16x16xf32>
    %94 = vector.extract_strided_slice %59 {offsets = [1, 0], sizes = [15, 16], strides = [1, 1]} : vector<16x16xf32> to vector<15x16xf32>
    %95 = vector.extract_strided_slice %59 {offsets = [0, 0], sizes = [1, 16], strides = [1, 1]} : vector<16x16xf32> to vector<1x16xf32>
    %96 = tpu.concatenate %94, %95 in 0 : vector<15x16xf32>, vector<1x16xf32> -> vector<16x16xf32>
    %97 = arith.select %85, %93, %96 : vector<16x16xi1>, vector<16x16xf32>
    %98 = vector.shape_cast %79 : vector<1x16xf32> to vector<1x16xf32>
    %99 = vector.broadcast %98 : vector<1x16xf32> to vector<16x16xf32>
    %100 = vector.extract_strided_slice %61 {offsets = [15, 0], sizes = [1, 16], strides = [1, 1]} : vector<16x16xf32> to vector<1x16xf32>
    %101 = vector.extract_strided_slice %61 {offsets = [0, 0], sizes = [15, 16], strides = [1, 1]} : vector<16x16xf32> to vector<15x16xf32>
    %102 = tpu.concatenate %100, %101 in 0 : vector<1x16xf32>, vector<15x16xf32> -> vector<16x16xf32>
    %103 = arith.select %83, %99, %102 : vector<16x16xi1>, vector<16x16xf32>
    %104 = vector.shape_cast %80 : vector<1x16xf32> to vector<1x16xf32>
    %105 = vector.broadcast %104 : vector<1x16xf32> to vector<16x16xf32>
    %106 = vector.extract_strided_slice %62 {offsets = [1, 0], sizes = [15, 16], strides = [1, 1]} : vector<16x16xf32> to vector<15x16xf32>
    %107 = vector.extract_strided_slice %62 {offsets = [0, 0], sizes = [1, 16], strides = [1, 1]} : vector<16x16xf32> to vector<1x16xf32>
    %108 = tpu.concatenate %106, %107 in 0 : vector<15x16xf32>, vector<1x16xf32> -> vector<16x16xf32>
    %109 = arith.select %85, %105, %108 : vector<16x16xi1>, vector<16x16xf32>
    %110 = arith.addf %55, %91 : vector<16x16xf32>
    %111 = arith.addf %110, %97 : vector<16x16xf32>
    %112 = arith.addf %60, %103 : vector<16x16xf32>
    %113 = arith.addf %112, %109 : vector<16x16xf32>
    %114 = arith.subf %91, %97 : vector<16x16xf32>
    %115 = arith.mulf %111, %111 : vector<16x16xf32>
    %cst = arith.constant -9.99999974E-5 : f32
    %116 = vector.broadcast %cst : f32 to vector<16x16xf32>
    %117 = arith.mulf %116, %115 : vector<16x16xf32>
    %118 = arith.addf %114, %117 : vector<16x16xf32>
    %c0_51 = arith.constant 0 : index
    %c0_52 = arith.constant 0 : index
    %c0_53 = arith.constant 0 : index
    %c0_54 = arith.constant 0 : index
    %119 = vector.load %arg6[%c0_51, %c0_52, %c0_53, %c0_54] : memref<1x3x16x16xf32, #tpu.memory_space<vmem>>, vector<1x1x16x16xf32>
    %120 = vector.shape_cast %119 : vector<1x1x16x16xf32> to vector<16x16xf32>
    %121 = vector.shape_cast %111 : vector<16x16xf32> to vector<1x1x16x16xf32>
    tpu.vector_store %arg6[%c0_51, %c0_52, %c0_53, %c0_54], %121 {strides = array<i32>} : memref<1x3x16x16xf32, #tpu.memory_space<vmem>>, vector<1x1x16x16xf32>,
    %c0_55 = arith.constant 0 : index
    %c1_56 = arith.constant 1 : index
    %c0_57 = arith.constant 0 : index
    %c0_58 = arith.constant 0 : index
    %122 = vector.load %arg6[%c0_55, %c1_56, %c0_57, %c0_58] : memref<1x3x16x16xf32, #tpu.memory_space<vmem>>, vector<1x1x16x16xf32>
    %123 = vector.shape_cast %122 : vector<1x1x16x16xf32> to vector<16x16xf32>
    %124 = vector.shape_cast %113 : vector<16x16xf32> to vector<1x1x16x16xf32>
    tpu.vector_store %arg6[%c0_55, %c1_56, %c0_57, %c0_58], %124 {strides = array<i32>} : memref<1x3x16x16xf32, #tpu.memory_space<vmem>>, vector<1x1x16x16xf32>,
    %c0_59 = arith.constant 0 : index
    %c2_60 = arith.constant 2 : index
    %c0_61 = arith.constant 0 : index
    %c0_62 = arith.constant 0 : index
    %125 = vector.load %arg6[%c0_59, %c2_60, %c0_61, %c0_62] : memref<1x3x16x16xf32, #tpu.memory_space<vmem>>, vector<1x1x16x16xf32>
    %126 = vector.shape_cast %125 : vector<1x1x16x16xf32> to vector<16x16xf32>
    %127 = vector.shape_cast %118 : vector<16x16xf32> to vector<1x1x16x16xf32>
    tpu.vector_store %arg6[%c0_59, %c2_60, %c0_61, %c0_62], %127 {strides = array<i32>} : memref<1x3x16x16xf32, #tpu.memory_space<vmem>>, vector<1x1x16x16xf32>,
    return
  }
  func.func @transform_0(%arg0: i32, %arg1: i32) -> i32 {
    %c0_i32 = arith.constant 0 : i32
    %c0_i32_0 = arith.constant 0 : i32
    return %c0_i32 : i32
  }
  func.func @transform_1(%arg0: i32, %arg1: i32) -> (i32, i32, i32, i32) {
    %c0_i32 = arith.constant 0 : i32
    %c0_i32_0 = arith.constant 0 : i32
    %c0_i32_1 = arith.constant 0 : i32
    return %arg0, %c0_i32, %arg1, %c0_i32_0 : i32, i32, i32, i32
  }
  func.func @transform_2(%arg0: i32, %arg1: i32) -> (i32, i32, i32, i32) {
    %c2_i32 = arith.constant 2 : i32
    %0 = arith.muli %arg1, %c2_i32 : i32
    %c2_i32_0 = arith.constant 2 : i32
    %1 = arith.addi %0, %c2_i32_0 : i32
    %c1_i32 = arith.constant 1 : i32
    %2 = arith.subi %1, %c1_i32 : i32
    %c2_i32_1 = arith.constant 2 : i32
    %c0_i32 = arith.constant 0 : i32
    %3 = arith.cmpi eq, %c2_i32_1, %c0_i32 : i32
    %c1_i32_2 = arith.constant 1 : i32
    %4 = arith.select %3, %c1_i32_2, %c2_i32_1 : i32
    %5 = arith.remsi %2, %4 : i32
    %c0_i32_3 = arith.constant 0 : i32
    %6 = arith.cmpi ne, %5, %c0_i32_3 : i32
    %c0_i32_4 = arith.constant 0 : i32
    %7 = arith.cmpi slt, %5, %c0_i32_4 : i32
    %c0_i32_5 = arith.constant 0 : i32
    %8 = arith.cmpi slt, %4, %c0_i32_5 : i32
    %9 = arith.xori %7, %8 : i1
    %10 = arith.andi %9, %6 : i1
    %11 = arith.addi %5, %4 : i32
    %12 = arith.select %10, %11, %5 : i32
    %c0_i32_6 = arith.constant 0 : i32
    %c0_i32_7 = arith.constant 0 : i32
    %c0_i32_8 = arith.constant 0 : i32
    return %arg0, %c0_i32_6, %12, %c0_i32_7 : i32, i32, i32, i32
  }
  func.func @transform_3(%arg0: i32, %arg1: i32) -> (i32, i32, i32, i32) {
    %c1_i32 = arith.constant 1 : i32
    %0 = arith.addi %arg1, %c1_i32 : i32
    %c2_i32 = arith.constant 2 : i32
    %1 = arith.muli %0, %c2_i32 : i32
    %c2_i32_0 = arith.constant 2 : i32
    %c0_i32 = arith.constant 0 : i32
    %2 = arith.cmpi eq, %c2_i32_0, %c0_i32 : i32
    %c1_i32_1 = arith.constant 1 : i32
    %3 = arith.select %2, %c1_i32_1, %c2_i32_0 : i32
    %4 = arith.remsi %1, %3 : i32
    %c0_i32_2 = arith.constant 0 : i32
    %5 = arith.cmpi ne, %4, %c0_i32_2 : i32
    %c0_i32_3 = arith.constant 0 : i32
    %6 = arith.cmpi slt, %4, %c0_i32_3 : i32
    %c0_i32_4 = arith.constant 0 : i32
    %7 = arith.cmpi slt, %3, %c0_i32_4 : i32
    %8 = arith.xori %6, %7 : i1
    %9 = arith.andi %8, %5 : i1
    %10 = arith.addi %4, %3 : i32
    %11 = arith.select %9, %10, %4 : i32
    %c0_i32_5 = arith.constant 0 : i32
    %c0_i32_6 = arith.constant 0 : i32
    %c0_i32_7 = arith.constant 0 : i32
    return %arg0, %c0_i32_5, %11, %c0_i32_6 : i32, i32, i32, i32
  }
  func.func @transform_4(%arg0: i32, %arg1: i32) -> (i32, i32, i32, i32) {
    %c0_i32 = arith.constant 0 : i32
    %c0_i32_0 = arith.constant 0 : i32
    %c0_i32_1 = arith.constant 0 : i32
    return %arg0, %c0_i32, %arg1, %c0_i32_0 : i32, i32, i32, i32
  }
}

</mosaic_0001>

<bundles_post_ra>
// kernel: tpu_custom_call.1
= control target key start
LH: loop header
LB: loop body
LE: loop exit
PB: predicated region body
PF: predicated region fallthrough
CT: control target
= control target key end

     0   :  { %6 = vsyncpa [#allocation3], 0  ;;  %s155_s0 = inlined_call_operand.hbm [shape: f32[16,256], index: 0, kind: input, shape index: {}]   ;;  %s156_s1 = inlined_call_operand.hbm [shape: f32[16,256], index: 1, kind: output, shape index: {}]  }
   0x1   :  { %7 = vsyncpa [#allocation4], 0  ;;  %s111_s6 = smov [#allocation2]   ;;  %s63_s10 = scalar_lea.hbm %s155_s0, 512 }
   0x2   :  { %s13_s7 = sshll.u32 %s111_s6, 4  ;;  %p64_p0 = scmp.ne.s32.totalorder %s155_s0, %s63_s10  ;;  %s14_s7 = int_to_ptr.vmem [resolvable:$true] %s13_s7 }
   0x3   :  { %p67_p1 = scmp.lt.u32.totalorder %s63_s10, %s155_s0 }
   0x5   :  { %p69_p2 = pnand %p67_p1, %p64_p0 }
   0x7   :  { %72 = shalt.err (!%p69_p2)
}
   0x8   :  { %s73_s15 = scalar_lea.vmem %s14_s7, 512  ;;  %p78_p4 = scmp.lt.s32.totalorder %s14_s7, %s14_s7 }
   0x9   :  { %p74_p3 = scmp.ne.s32.totalorder %s14_s7, %s73_s15  ;;  %p79_p5 = scmp.lt.s32.totalorder %s73_s15, %s73_s15 }
   0xb   :  { %p80_p6 = por %p79_p5, %p78_p4 }
   0xd   :  { %p81_p7 = pnand %p80_p6, %p74_p3 }
   0xf   :  { %84 = shalt.err (!%p81_p7)
}
  0x10   :  { %s112_s16 = smov 256   ;;  %s113_s17 = smov 16  }
  0x11   :  { %19 = dma.hbm_to_vmem [thread:$0]  %s155_s0, 512, %s14_s7, [#allocation3], %s112_s16, %s112_s16, %s113_s17  }
  0x12   :  { %107 = dma.done.wait [#allocation3], 512  }
  0x13   :  { %108 = vsyncadd [#allocation3], 4294966784  ;;  %v31_v0 = vlaneseq  ;;  %v23_v2 = vld [vmem:[#allocation2] sm:$0xff]  ;;  %v25_v3 = vld [vmem:[#allocation2 + $0x10] sm:$0xff]  ;;  %s114_s20 = smov [#allocation5]  }
  0x14   :  { %v24_v4 = vld [vmem:[#allocation2 + $0x8] sm:$0xff]  ;;  %s47_s21 = sshll.u32 %s114_s20, 4  ;;  %v27_v5 = vrot.slane %v23_v2, 7  ;;  %v29_v6 = vrot.slane %v25_v3, 7  ;;  %v26_v7 = vld [vmem:[#allocation2 + $0x18] sm:$0xff]  ;;  %s48_s21 = int_to_ptr.vmem [resolvable:$true] %s47_s21 }
  0x15   :  { %v32_v1 = vshrl.u32 %v31_v0, 7  ;;  %v28_v8 = vrot.slane %v24_v4, 7  ;;  %v30_v9 = vrot.slane %v26_v7, 7  ;;  %s85_s0 = scalar_lea.vmem %s48_s21, 512  ;;  %p90_p9 = scmp.lt.s32.totalorder %s48_s21, %s48_s21 }
  0x16   :  { %p86_p8 = scmp.ne.s32.totalorder %s48_s21, %s85_s0  ;;  %p91_p10 = scmp.lt.s32.totalorder %s85_s0, %s85_s0 }
  0x17   :  { %vm33_vm0 = vcmp.lt.s32.totalorder %v32_v1, 1 }
  0x18   :  { %v36_v10 = vsel %vm33_vm0, %v29_v6, %v27_v5  ;;  %v34_v11 = vsel %vm33_vm0, %v27_v5, %v29_v6  ;;  %v37_v12 = vsel %vm33_vm0, %v30_v9, %v28_v8  ;;  %v35_v13 = vsel %vm33_vm0, %v28_v8, %v30_v9  ;;  %p92_p11 = por %p91_p10, %p90_p9 }
  0x19   :  { %38 = vst [vmem:[#allocation5] sm:$0xff] %v36_v10  ;;  %40 = vst [vmem:[#allocation5 + $0x10] sm:$0xff] %v34_v11 }
  0x1a   :  { %39 = vst [vmem:[#allocation5 + $0x8] sm:$0xff] %v37_v12  ;;  %41 = vst [vmem:[#allocation5 + $0x18] sm:$0xff] %v35_v13  ;;  %p93_p12 = pnand %p92_p11, %p86_p8 }
  0x1c   :  { %96 = shalt.err (!%p93_p12)
}
  0x1d   :  { %s97_s24 = scalar_lea.hbm %s156_s1, 512 }
  0x1e   :  { %p98_p13 = scmp.ne.s32.totalorder %s156_s1, %s97_s24  ;;  %p101_p0 = scmp.lt.u32.totalorder %s97_s24, %s156_s1 }
  0x20   :  { %p103_p1 = pnand %p101_p0, %p98_p13 }
  0x22   :  { %106 = shalt.err (!%p103_p1)
}
  0x23   :  { %53 = dma.vmem_to_hbm [thread:$0]  %s48_s21, 512, %s156_s1, [#allocation4], %s112_s16, %s112_s16, %s113_s17  }
  0x24   :  { %109 = dma.done.wait [#allocation4], 512  }
  0x25   :  { %110 = vsyncadd [#allocation4], 4294966784 }
  0x26   :  { %57 = vsyncpa [#allocation3], 1 }
  0x27   :  { %58 = vsyncpa [#allocation4], 1 }

// kernel: tpu_custom_call.1
= control target key start
LH: loop header
LB: loop body
LE: loop exit
PB: predicated region body
PF: predicated region fallthrough
CT: control target
= control target key end

     0   :  { %6 = vsyncpa [#allocation3], 0  ;;  %s161_s0 = inlined_call_operand.hbm [shape: f32[16,256], index: 0, kind: input, shape index: {}]   ;;  %s162_s1 = inlined_call_operand.hbm [shape: f32[16,256], index: 1, kind: output, shape index: {}]  }
   0x1   :  { %7 = vsyncpa [#allocation4], 0  ;;  %s116_s6 = smov [#allocation2]   ;;  %s68_s10 = scalar_lea.hbm %s161_s0, 512 }
   0x2   :  { %s13_s7 = sshll.u32 %s116_s6, 4  ;;  %p69_p0 = scmp.ne.s32.totalorder %s161_s0, %s68_s10  ;;  %s14_s7 = int_to_ptr.vmem [resolvable:$true] %s13_s7 }
   0x3   :  { %p72_p1 = scmp.lt.u32.totalorder %s68_s10, %s161_s0 }
   0x5   :  { %p74_p2 = pnand %p72_p1, %p69_p0 }
   0x7   :  { %77 = shalt.err (!%p74_p2)
}
   0x8   :  { %s78_s15 = scalar_lea.vmem %s14_s7, 512  ;;  %p83_p4 = scmp.lt.s32.totalorder %s14_s7, %s14_s7 }
   0x9   :  { %p79_p3 = scmp.ne.s32.totalorder %s14_s7, %s78_s15  ;;  %p84_p5 = scmp.lt.s32.totalorder %s78_s15, %s78_s15 }
   0xb   :  { %p85_p6 = por %p84_p5, %p83_p4 }
   0xd   :  { %p86_p7 = pnand %p85_p6, %p79_p3 }
   0xf   :  { %89 = shalt.err (!%p86_p7)
}
  0x10   :  { %s117_s16 = smov 256   ;;  %s118_s17 = smov 16  }
  0x11   :  { %19 = dma.hbm_to_vmem [thread:$0]  %s161_s0, 512, %s14_s7, [#allocation3], %s117_s16, %s117_s16, %s118_s17  }
  0x12   :  { %112 = dma.done.wait [#allocation3], 512  }
  0x13   :  { %113 = vsyncadd [#allocation3], 4294966784  ;;  %v24_v0 = vld [vmem:[#allocation2 + $0x8] sm:$0xff]  ;;  %v23_v1 = vld [vmem:[#allocation2] sm:$0xff]  ;;  %s119_s20 = smov 1   ;;  %v35_v4 = vlaneseq  ;;  %s120_s21 = smov [#allocation5]  }
  0x14   :  { %31 = vrot.lane.b32.xlu1 %v24_v0, %s119_s20  ;;  %27 = vrot.lane.b32.xlu0 %v23_v1, %s119_s20  ;;  %v26_v2 = vld [vmem:[#allocation2 + $0x18] sm:$0xff]  ;;  %v25_v3 = vld [vmem:[#allocation2 + $0x10] sm:$0xff]  ;;  %s51_s0 = sshll.u32 %s120_s21, 4  ;;  %s52_s0 = int_to_ptr.vmem [resolvable:$true] %s51_s0 }
  0x15   :  { %v36_v5 = vand.u32 127, %v35_v4  ;;  %s90_s22 = scalar_lea.vmem %s52_s0, 512  ;;  %p95_p9 = scmp.lt.s32.totalorder %s52_s0, %s52_s0 }
  0x16   :  { %p91_p8 = scmp.ne.s32.totalorder %s52_s0, %s90_s22  ;;  %p96_p10 = scmp.lt.s32.totalorder %s90_s22, %s90_s22 }
  0x17   :  { %vm37_vm0 = vcmp.lt.s32.totalorder %v36_v5, 1 }
  0x18   :  { %33 = vrot.lane.b32.xlu1 %v26_v2, %s119_s20  ;;  %29 = vrot.lane.b32.xlu0 %v25_v3, %s119_s20  ;;  %p97_p11 = por %p96_p10, %p95_p9 }
  0x1a   :  { %p98_p12 = pnand %p97_p11, %p91_p8 }
  0x86   :  { %v32_v6 = vpop.permute.xlu1 %31  ;;  %v28_v7 = vpop.permute.xlu0 %27 }
  0x87   :  { %v38_v8 = vsel %vm37_vm0, %v28_v7, %v32_v6  ;;  %v40_v9 = vsel %vm37_vm0, %v32_v6, %v28_v7 }
  0x88   :  { %42 = vst [vmem:[#allocation5] sm:$0xff] %v40_v9  ;;  %43 = vst [vmem:[#allocation5 + $0x8] sm:$0xff] %v38_v8 }
  0x8a   :  { %v34_v10 = vpop.permute.xlu1 %33  ;;  %v30_v11 = vpop.permute.xlu0 %29 }
  0x8b   :  { %v39_v12 = vsel %vm37_vm0, %v30_v11, %v34_v10  ;;  %v41_v13 = vsel %vm37_vm0, %v34_v10, %v30_v11 }
  0x8c   :  { %44 = vst [vmem:[#allocation5 + $0x10] sm:$0xff] %v41_v13  ;;  %45 = vst [vmem:[#allocation5 + $0x18] sm:$0xff] %v39_v12 }
  0x8d   :  { %101 = shalt.err (!%p98_p12)
}
  0x8e   :  { %s102_s25 = scalar_lea.hbm %s162_s1, 512 }
  0x8f   :  { %p103_p13 = scmp.ne.s32.totalorder %s162_s1, %s102_s25  ;;  %p106_p0 = scmp.lt.u32.totalorder %s102_s25, %s162_s1 }
  0x91   :  { %p108_p1 = pnand %p106_p0, %p103_p13 }
  0x93   :  { %111 = shalt.err (!%p108_p1)
}
  0x94   :  { %57 = dma.vmem_to_hbm [thread:$0]  %s52_s0, 512, %s162_s1, [#allocation4], %s117_s16, %s117_s16, %s118_s17  }
  0x95   :  { %114 = dma.done.wait [#allocation4], 512  }
  0x96   :  { %115 = vsyncadd [#allocation4], 4294966784 }
  0x97   :  { %61 = vsyncpa [#allocation3], 1 }
  0x98   :  { %62 = vsyncpa [#allocation4], 1 }

// kernel: tpu_custom_call.1
= control target key start
LH: loop header
LB: loop body
LE: loop exit
PB: predicated region body
PF: predicated region fallthrough
CT: control target
= control target key end

     0   :  { %s1689_s0 = inlined_call_operand.hbm [shape: f32[6], index: 0, kind: input, shape index: {}]   ;;  %s1690_s1 = inlined_call_operand.hbm [shape: f32[2,9,16,16], index: 1, kind: input, shape index: {}]   ;;  %s1691_s2 = inlined_call_operand.hbm [shape: f32[2,9,16,16], index: 2, kind: input, shape index: {}]   ;;  %s1692_s3 = inlined_call_operand.hbm [shape: f32[2,9,16,16], index: 3, kind: input, shape index: {}]   ;;  %s1693_s4 = inlined_call_operand.hbm [shape: f32[2,3,16,16], index: 4, kind: output, shape index: {}]  }
   0x1   :  { %1712 = sst [smem:[#allocation21_spill]] %s1690_s1 }
   0x2   :  { %1713 = sst [smem:[#allocation22_spill]] %s1691_s2 }
   0x3   :  { %9 = vsyncpa [#allocation5], 0 }
   0x4   :  { %10 = vsyncpa [#allocation3], 0 }
   0x5   :  { %12 = vsyncpa [#allocation3 + $0x1], 0 }
   0x6   :  { %13 = vsyncpa [#allocation8], 0 }
   0x7   :  { %15 = vsyncpa [#allocation8 + $0x1], 0 }
   0x8   :  { %16 = vsyncpa [#allocation4], 0 }
   0x9   :  { %18 = vsyncpa [#allocation4 + $0x1], 0  ;;  %s1269_s15 = smov 0   ;;  %s1271_s16 = smov 0  }
   0xa   :  { %s1273_s17 = smov 0   ;;  %s1275_s18 = smov 0  }
   0xb   :  { %s1277_s19 = smov 0   ;;  %s1279_s20 = smov 0  }
   0xc LB: > { %1714 = sst [smem:[#allocation15_spill]] %s1216_s17  ;;  %s36_s21 = sadd.s32 1, %s1224_s19  ;;  %s1228_s20 = sphi %s1279_s20, %s24_s20   ;;  %s1224_s19 = sphi %s1277_s19, %s1747_s19   ;;  %s1220_s18 = sphi %s1275_s18, %s1746_s18   ;;  %s1216_s17 = sphi %s1273_s17, %s1750_s17   ;;  %s1212_s16 = sphi %s1271_s16, %s1749_s16   ;;  %s1208_s15 = sphi %s1269_s15, %s1748_s15  }
   0xd   : > { %1715 = sst [smem:[#allocation16_spill]] %s1224_s19  ;;  %s66_s22 = sadd.s32 1, %s1216_s17 }
   0xe   : > { %1716 = sst [smem:[#allocation17_spill]] %s1228_s20  ;;  %p38_p0 = scmp.ge.s32.totalorder %s36_s21, 2 }
   0xf   : > { %p1694_p1 = scmp.ne.s32.totalorder %s1216_s17, %s1212_s16  ;;  %p74_p2 = scmp.eq.s32.totalorder %s1228_s20, 0 }
  0x10   : > { %s1752_s21 = smov (%p38_p0, %s36_s21), 0  ;;  %p973_p5 = scmp.lt.s32.totalorder %s1228_s20, 2 }
  0x11   : > { %1717 = sst [smem:[#allocation18_spill]] %s1752_s21  ;;  %p75_p4 = por %p74_p2, %p1694_p1 }
  0x12   : > { %s61_s23 = ssub.s32 %s1224_s19, %s1752_s21  ;;  %s1314_s24 = sand.u32 1, %s1216_s17  }
  0x13   : > { %p64_p6 = scmp.eq.s32.totalorder %s61_s23, 0  ;;  %s1317_s25 = smul.u32 2304, %s1224_s19 }
  0x14   : > { %p1319_p7 = pnand %p973_p5, %p75_p4  ;;  %s275_s28 = sand.u32 1, %s1228_s20  }
  0x15   : > { %s1324_s27 = scalar_select %p64_p6, %s1216_s17, %s66_s22  }
  0x16   : > { %s1696_s29 = smul.u32 72, %s1314_s24  ;;  %s931_s30 = sadd.s32 128, %s1317_s25 }
  0x17   : > { %1719 = sst [smem:[#allocation19_spill]] %s1324_s27  ;;  %s1720_s2 = sld [smem:[#allocation22_spill]] }
  0x18   : > { %s279_s8 = scalar_lea.vmem [#allocation7], %s1696_s29  ;;  %s1338_s10 = scalar_lea.sflag [#allocation8], %s275_s28 }
  0x19   : > { %s301_s9 = sshll.u32 %s279_s8, 4  ;;  %p1344_p9 = pneg %p1319_p7  ;;  %s1336_s9 = int_to_ptr.vmem [resolvable:$true] %s301_s9 }
  0x1d   : > { %s1332_s7 = scalar_lea.hbm %s1720_s2, %s931_s30  ;;  %s1040_s22 = scalar_lea.hbm %s1720_s2, 4608 }
  0x1e   : > { %s1035_s11 = scalar_lea.hbm %s1332_s7, 1152  ;;  %p1041_p12 = scmp.lt.u32.totalorder %s1332_s7, %s1720_s2 }
  0x1f   : > { %p1036_p8 = scmp.ne.s32.totalorder %s1332_s7, %s1035_s11  ;;  %p1042_p13 = scmp.lt.u32.totalorder %s1040_s22, %s1035_s11 }
  0x20   : > { %p1044_p2 = scmp.lt.u32.totalorder %s1035_s11, %s1332_s7 }
  0x21   : > { %p1038_p10 = pnand %p1344_p9, %p1036_p8  ;;  %p1043_p0 = por %p1042_p13, %p1041_p12 }
  0x23   : > { %p1039_p11 = pneg %p1038_p10  ;;  %p1045_p4 = por %p1044_p2, %p1043_p0 }
  0x25   : > { %p1046_p5 = pnand %p1045_p4, %p1039_p11 }
  0x27   : > { %1049 = shalt.err (!%p1046_p5)
}
  0x28   : > { %s1050_s28 = scalar_lea.vmem %s1336_s9, 1152  ;;  %s1230_s5 = smov [#allocation7]  }
  0x29   : > { %p1051_p6 = scmp.ne.s32.totalorder %s1336_s9, %s1050_s28  ;;  %s1055_s6 = sshll.u32 %s1230_s5, 4  ;;  %s1056_s6 = int_to_ptr.vmem [resolvable:$false] %s1055_s6 }
  0x2a   : > { %s1057_s8 = scalar_lea.vmem %s1056_s6, 2304  ;;  %p1058_p3 = scmp.lt.s32.totalorder %s1336_s9, %s1056_s6 }
  0x2b   : > { %p1053_p8 = pnand %p1051_p6, %p1344_p9  ;;  %p1059_p1 = scmp.lt.s32.totalorder %s1057_s8, %s1050_s28 }
  0x2d   : > { %p1054_p10 = pneg %p1053_p8  ;;  %p1060_p12 = por %p1059_p1, %p1058_p3 }
  0x2f   : > { %p1061_p13 = pnand %p1060_p12, %p1054_p10 }
  0x31   : > { %1064 = shalt.err (!%p1061_p13)
}
  0x32   : > { %s1695_s11 = smov 256   ;;  %s1697_s13 = smov 128  }
  0x33   : > { %s1699_s14 = smov 8   ;;  %s1372_s22 = sadd.s32 4294967295, %s1228_s20  }
  0x34   : > { %964 = dma.hbm_to_vmem [thread:$0]  (!%p1319_p7), %s1332_s7, 1152, %s1336_s9, %s1338_s10, %s1695_s11, %s1697_s13, %s1699_s14  }
  0x35   : > { %s892_s23 = sadd.s32 4294967294, %s1228_s20   ;;  %p79_p1 = scmp.ne.s32.totalorder %s1212_s16, %s1208_s15 }
  0x36   : > { %p1703_p3 = scmp.eq.s32.totalorder %s1372_s22, 0  ;;  %p217_p11 = scmp.eq.s32.totalorder %s1372_s22, 1 }
  0x37   : > { %p223_p0 = scmp.eq.s32.totalorder %s892_s23, 1  ;;  %p893_p4 = scmp.ge.s32.totalorder %s1228_s20, 1 }
  0x38   : > { %p1381_p2 = por %p1703_p3, %p79_p1  ;;  %p1723_p5 = scmp.ne.s32.totalorder %s1216_s17, %s1212_s16 }
  0x39   : > { %p1393_p8 = por %p223_p0, %p79_p1  ;;  %p230_p10 = scmp.lt.s32.totalorder %s1228_s20, 3 }
  0x3a   : > { %s1722_s30 = scalar_select %p1381_p2, 1, 0 }
  0x3b   : > { %p1389_p6 = por %p217_p11, %p1723_p5  ;;  %p1398_p12 = pnand %p893_p4, %p230_p10 }
  0x3c   : > { %s1725_s9 = scalar_select %p1393_p8, 1, 0 }
  0x3d   : > { %s1724_s7 = scalar_select %p1389_p6, 1, 0 }
  0x3e   : > { %1726 = sst [smem:[#allocation20_spill]] %s1725_s9  ;;  %s932_s5 = smul.u32 144, %s1314_s24 }
  0x3f   : > { %s1727_s28 = scalar_select %p1398_p12, 1, 0 }
  0x40   : > { %s1728_s1 = sld [smem:[#allocation21_spill]]  ;;  %p954_p13 = pneg %p1398_p12 }
  0x41   : > { %s256_s11 = scalar_lea.vmem [#allocation6], %s932_s5  ;;  %s1415_s2 = scalar_lea.hbm %s1692_s3, %s1317_s25 }
  0x42   : > { %s265_s29 = sshll.u32 %s256_s11, 4  ;;  %p1419_p1 = pnand %p954_p13, %p1703_p3  ;;  %s1423_s29 = int_to_ptr.vmem [resolvable:$true] %s265_s29 }
  0x43   : > { %s253_s6 = scalar_lea.sflag [#allocation3], %s1314_s24 }
  0x44   : > { %s1729_s21 = scalar_select %p1419_p1, 1, 0 }
  0x46   : > { %s1407_s23 = scalar_lea.hbm %s1728_s1, %s1317_s25  ;;  %s1070_s19 = scalar_lea.hbm %s1728_s1, 4608 }
  0x47   : > { %s1065_s8 = scalar_lea.hbm %s1407_s23, 2304  ;;  %p1071_p5 = scmp.lt.u32.totalorder %s1407_s23, %s1728_s1 }
  0x48   : > { %p1066_p11 = scmp.ne.s32.totalorder %s1407_s23, %s1065_s8  ;;  %p1072_p10 = scmp.lt.u32.totalorder %s1070_s19, %s1065_s8 }
  0x49   : > { %p1074_p3 = scmp.lt.u32.totalorder %s1065_s8, %s1407_s23 }
  0x4a   : > { %p1068_p0 = pnand %p1066_p11, %p1344_p9  ;;  %p1073_p13 = por %p1072_p10, %p1071_p5 }
  0x4c   : > { %p1069_p4 = pneg %p1068_p0  ;;  %p1075_p8 = por %p1074_p3, %p1073_p13 }
  0x4e   : > { %p1076_p6 = pnand %p1075_p8, %p1069_p4 }
  0x50   : > { %1079 = shalt.err (!%p1076_p6)
}
  0x51   : > { %s1080_s14 = scalar_lea.vmem %s1423_s29, 2304  ;;  %s1234_s5 = smov [#allocation6]  }
  0x52   : > { %p1081_p11 = scmp.ne.s32.totalorder %s1423_s29, %s1080_s14  ;;  %s1085_s11 = sshll.u32 %s1234_s5, 4  ;;  %s1086_s11 = int_to_ptr.vmem [resolvable:$false] %s1085_s11 }
  0x53   : > { %s1087_s13 = scalar_lea.vmem %s1086_s11, 4608  ;;  %p1088_p12 = scmp.lt.s32.totalorder %s1423_s29, %s1086_s11 }
  0x54   : > { %p1083_p0 = pnand %p1081_p11, %p1344_p9  ;;  %p1089_p1 = scmp.lt.s32.totalorder %s1087_s13, %s1080_s14 }
  0x56   : > { %p1084_p2 = pneg %p1083_p0  ;;  %p1090_p5 = por %p1089_p1, %p1088_p12 }
  0x58   : > { %p1091_p10 = pnand %p1090_p5, %p1084_p2 }
  0x5a   : > { %1094 = shalt.err (!%p1091_p10)
}
  0x5b   : > { %s1730_s19 = smov 8   ;;  %s1731_s8 = smov 128  }
  0x5c   : > { %961 = dma.hbm_to_vmem [thread:$0]  (!%p1319_p7), %s1407_s23, 2304, %s1423_s29, %s253_s6, %s1731_s8, %s1731_s8, %s1730_s19  }
  0x5d   : > { %s1732_s25 = smul.u32 72, %s1314_s24  ;;  %s1095_s13 = scalar_lea.hbm %s1689_s0, 16 }
  0x5e   : > { %p1096_p3 = scmp.ne.s32.totalorder %s1689_s0, %s1095_s13  ;;  %p1733_p2 = scmp.ne.s32.totalorder %s1729_s21, 0 }
  0x5f   : > { %s315_s5 = scalar_lea.vmem [#allocation9], %s1732_s25  ;;  %p1102_p1 = scmp.lt.u32.totalorder %s1095_s13, %s1689_s0 }
  0x60   : > { %s337_s1 = sshll.u32 %s315_s5, 4  ;;  %p1097_p6 = pneg %p1733_p2  ;;  %s1470_s1 = int_to_ptr.vmem [resolvable:$true] %s337_s1 }
  0x62   : > { %p1098_p8 = pnand %p1097_p6, %p1096_p3 }
  0x64   : > { %p1099_p12 = pneg %p1098_p8 }
  0x66   : > { %p1104_p4 = pnand %p1102_p1, %p1099_p12 }
  0x68   : > { %1107 = shalt.err (!%p1104_p4)
}
  0x69   : > { %s1235_s24 = smov [#allocation2]   ;;  %s1108_s17 = scalar_lea.hbm %s1415_s2, 1152 }
  0x6a   : > { %957 = dma.hbm_to_smem (!%p1733_p2), %s1689_s0, 16, %s1235_s24, [#allocation5]  }
  0x6b   : > { %p1109_p13 = scmp.ne.s32.totalorder %s1415_s2, %s1108_s17  ;;  %s1113_s21 = scalar_lea.hbm %s1692_s3, 4608 }
  0x6c   : > { %p1114_p5 = scmp.lt.u32.totalorder %s1415_s2, %s1692_s3  ;;  %p1115_p10 = scmp.lt.u32.totalorder %s1113_s21, %s1108_s17 }
  0x6d   : > { %p1111_p11 = pnand %p1109_p13, %p1344_p9  ;;  %p1117_p6 = scmp.lt.u32.totalorder %s1108_s17, %s1415_s2 }
  0x6e   : > { %p1116_p3 = por %p1115_p10, %p1114_p5 }
  0x6f   : > { %p1112_p0 = pneg %p1111_p11 }
  0x70   : > { %p1118_p8 = por %p1117_p6, %p1116_p3 }
  0x72   : > { %p1119_p2 = pnand %p1118_p8, %p1112_p0 }
  0x74   : > { %1122 = shalt.err (!%p1119_p2)
}
  0x75   : > { %s1123_s25 = scalar_lea.vmem %s1470_s1, 1152  ;;  %s1236_s5 = smov [#allocation9]  }
  0x76   : > { %p1124_p12 = scmp.ne.s32.totalorder %s1470_s1, %s1123_s25  ;;  %s1128_s11 = sshll.u32 %s1236_s5, 4  ;;  %s1129_s11 = int_to_ptr.vmem [resolvable:$false] %s1128_s11 }
  0x77   : > { %s1130_s14 = scalar_lea.vmem %s1129_s11, 2304  ;;  %p1131_p13 = scmp.lt.s32.totalorder %s1470_s1, %s1129_s11 }
  0x78   : > { %p1126_p1 = pnand %p1124_p12, %p1344_p9  ;;  %p1132_p11 = scmp.lt.s32.totalorder %s1130_s14, %s1123_s25 }
  0x7a   : > { %p1127_p4 = pneg %p1126_p1  ;;  %p1133_p5 = por %p1132_p11, %p1131_p13 }
  0x7c   : > { %p1134_p10 = pnand %p1133_p5, %p1127_p4 }
  0x7e   : > { %1137 = shalt.err (!%p1134_p10)
}
  0x7f   : > { %s1734_s13 = smov 256   ;;  %p1735_p9 = scmp.ne.s32.totalorder %s1727_s28, 0 }
  0x80   : > { %967 = dma.hbm_to_vmem [thread:$0]  (!%p1319_p7), %s1415_s2, 1152, %s1470_s1, %s1338_s10, %s1734_s13, %s1731_s8, %s1730_s19  }
  0x81   : > { %349 = sbr.rel (%p1735_p9) target bundleno = 352 (0x160), region = 36  ;;  %p1736_p0 = scmp.eq.s32.totalorder (!%p1735_p9), %s1372_s22, 0 }
  0x88   : > { %1191 = dma.done.wait (%p1736_p0), [#allocation5], 16   ;;  %p1737_p3 = pmov %p1736_p0 }
  0x89   : > { %s1504_s12 = sand.u32 1, %s1212_s16   ;;  %p1738_p7 = scmp.ne.s32.totalorder %s1722_s30, 0 }
  0x8a   : > { %1193 = vsyncadd (%p1737_p3), [#allocation5], 4294967280  ;;  %s938_s26 = smul.u32 144, %s1504_s12  ;;  %s356_s24 = scalar_lea.sflag [#allocation3], %s1504_s12 }
  0x8c   : > { %s1508_s29 = scalar_lea.vmem [#allocation6], %s938_s26 }
  0x8d   : > { %1195 = dma.done.wait (%p1738_p7), %s356_s24, 2304  }
  0x8e   : > { %1197 = vsyncadd (%p1738_p7), %s356_s24, 4294964992  ;;  %s364_s1 = sand.u32 1, %s1372_s22   ;;  %s939_s2 = smul.u32 72, %s1504_s12 }
  0x8f   : > { %s365_s10 = scalar_lea.sflag [#allocation8], %s364_s1 }
  0x90   : > { %s1516_s28 = scalar_lea.vmem [#allocation7], %s939_s2 }
  0x91   : > { %1199 = dma.done.wait (%p1738_p7), %s365_s10, 2304  }
  0x92   : > { %1201 = vsyncadd (%p1738_p7), %s365_s10, 4294964992  ;;  %s1522_s19 = scalar_lea.vmem [#allocation9], %s939_s2 }
  0x93   : > { %382 = sfence }
  0x94   : > { %v909_v0 = vld [vmem:[%s1508_s29 + $0x50] sm:$0xff]  ;;  %s1237_s8 = smov 1   ;;  %s1238_s22 = smov 113   ;;  %v910_v1 = vld [vmem:[%s1508_s29 + $0x58] sm:$0xff]  ;;  %v918_v2 = vld [vmem:[%s1516_s28 + $0x28] sm:$0xff]  ;;  %vm495_vm0 = vcmask 7168   ;;  %v635_v38 = vlaneseq }
  0x95   : > { %523 = vrot.lane.b32.xlu1 %v909_v0, %s1237_s8  ;;  %517 = vrot.lane.b32.xlu0 %v909_v0, %s1238_s22  ;;  %v912_v3 = vld [vmem:[%s1508_s29 + $0x68] sm:$0xff]  ;;  %v911_v4 = vld [vmem:[%s1508_s29 + $0x60] sm:$0xff]  ;;  %s1239_s30 = smov 127   ;;  %s1240_s23 = smov 15   ;;  %vm512_vm1 = vcmask 121856   ;;  %vm650_vm2 = vcmask 1040384  }
  0x96   : > { %v914_v5 = vld [vmem:[%s1508_s29 + $0x78] sm:$0xff]  ;;  %v913_v6 = vld [vmem:[%s1508_s29 + $0x70] sm:$0xff]  ;;  %v921_v8 = vld [vmem:[%s1522_s19 + $0x38] sm:$0xff]  ;;  %v1582_v48 = vshrl.u32 %v635_v38, 7  ;;  %vm664_vm3 = vcmask 1046528   ;;  %vm720_vm6 = vcmask 130048  }
  0x97   : > { %v919_v7 = vld [vmem:[%s1516_s28 + $0x30] sm:$0xff]  ;;  %v902_v9 = vld [vmem:[%s1508_s29 + $0x18] sm:$0xff]  ;;  %v915_v12 = vld [vmem:[%s1508_s29 + $0x80] sm:$0xff]  ;;  %s940_s17 = smul.u32 48, %s1504_s12  ;;  %s730_s25 = scalar_lea.sflag [#allocation4], %s1504_s12 }
  0x98   : > { %v901_v10 = vld [vmem:[%s1508_s29 + $0x10] sm:$0xff]  ;;  %v916_v11 = vld [vmem:[%s1508_s29 + $0x88] sm:$0xff]  ;;  %v906_v14 = vld [vmem:[%s1508_s29 + $0x38] sm:$0xff]  ;;  %v644_v62 = vsub.s32 7, %v1582_v48  ;;  %vm638_vm5 = vcmp.eq.s32.totalorder %v1582_v48, 0  ;;  %s941_s20 = smul.u32 768, %s1220_s18 }
  0x99   : > { %525 = vrot.lane.b32.xlu1 %v910_v1, %s1237_s8  ;;  %519 = vrot.lane.b32.xlu0 %v910_v1, %s1238_s22  ;;  %v922_v13 = vld [vmem:[%s1522_s19 + $0x40] sm:$0xff]  ;;  %v903_v41 = vld [vmem:[%s1508_s29 + $0x20] sm:$0xff]  ;;  %s412_s27 = scalar_lea.vmem [#allocation10], %s940_s17  ;;  %p1739_p8 = scmp.ne.s32.totalorder %s1724_s7, 0 }
  0x9a   : > { %v905_v15 = vld [vmem:[%s1508_s29 + $0x30] sm:$0xff]  ;;  %v904_v39 = vld [vmem:[%s1508_s29 + $0x28] sm:$0xff]  ;;  %v907_v60 = vld [vmem:[%s1508_s29 + $0x40] sm:$0xff]  ;;  %s745_s21 = sshll.u32 %s412_s27, 4  ;;  %s1636_s6 = scalar_lea.hbm %s1693_s4, %s941_s20  ;;  %s1638_s21 = int_to_ptr.vmem [resolvable:$true] %s745_s21 }
  0x9b   : > { %v917_v50 = vld [vmem:[%s1516_s28 + $0x10] sm:$0xff]  ;;  %s1138_s5 = scalar_lea.vmem %s1638_s21, 768  ;;  %s1241_s11 = smov [#allocation10]  }
  0x9c   : > { %v908_v58 = vld [vmem:[%s1508_s29 + $0x48] sm:$0xff]  ;;  %p1139_p6 = scmp.ne.s32.totalorder %s1638_s21, %s1138_s5  ;;  %s1142_s14 = sshll.u32 %s1241_s11, 4  ;;  %s1143_s14 = int_to_ptr.vmem [resolvable:$false] %s1142_s14 }
  0x9d   : > { %601 = vrot.lane.b32.xlu1 %v918_v2, %s1237_s8  ;;  %598 = vrot.lane.b32.xlu0 %v918_v2, %s1238_s22  ;;  %v920_v1 = vld [vmem:[%s1522_s19 + $0x20] sm:$0xff]  ;;  %s1144_s13 = scalar_lea.vmem %s1143_s14, 1536  ;;  %p1145_p1 = scmp.lt.s32.totalorder %s1638_s21, %s1143_s14 }
  0x9e   : > { %p1140_p2 = pnand %p1139_p6, %p1739_p8  ;;  %p1146_p4 = scmp.lt.s32.totalorder %s1144_s13, %s1138_s5 }
  0xa0   : > { %p1141_p12 = pneg %p1140_p2  ;;  %p1147_p13 = por %p1146_p4, %p1145_p1 }
  0xa1   : > { %535 = vrot.lane.b32.xlu1 %v912_v3, %s1239_s30  ;;  %533 = vrot.lane.b32.xlu0 %v911_v4, %s1239_s30 }
  0xa2   : > { %p1148_p11 = pnand %p1147_p13, %p1141_p12 }
  0xa5   : > { %541 = vrot.lane.b32.xlu1 %v912_v3, %s1240_s23  ;;  %539 = vrot.lane.b32.xlu0 %v911_v4, %s1240_s23  ;;  %v1595_v3 = vadd.s32 8, %v1582_v48 }
  0xa7   : > { %vm641_vm4 = vcmp.eq.s32.totalorder %v1595_v3, 15 }
  0xa9   : > { %551 = vrot.lane.b32.xlu1 %v914_v5, %s1239_s30  ;;  %549 = vrot.lane.b32.xlu0 %v913_v6, %s1239_s30 }
  0xad   : > { %557 = vrot.lane.b32.xlu1 %v914_v5, %s1240_s23  ;;  %555 = vrot.lane.b32.xlu0 %v913_v6, %s1240_s23 }
  0xb1   : > { %609 = vrot.lane.b32.xlu1 %v919_v7, %s1240_s23  ;;  %606 = vrot.lane.b32.xlu0 %v919_v7, %s1239_s30 }
  0xb5   : > { %617 = vrot.lane.b32.xlu1 %v921_v8, %s1240_s23  ;;  %614 = vrot.lane.b32.xlu0 %v921_v8, %s1239_s30 }
  0xb9   : > { %485 = vrot.lane.b32.xlu1 %v902_v9, %s1238_s22  ;;  %483 = vrot.lane.b32.xlu0 %v901_v10, %s1238_s22 }
  0xbd   : > { %491 = vrot.lane.b32.xlu1 %v902_v9, %s1237_s8  ;;  %489 = vrot.lane.b32.xlu0 %v901_v10, %s1237_s8 }
  0xc1   : > { %567 = vrot.lane.b32.xlu1 %v916_v11, %s1238_s22  ;;  %565 = vrot.lane.b32.xlu0 %v915_v12, %s1238_s22 }
  0xc5   : > { %573 = vrot.lane.b32.xlu1 %v916_v11, %s1237_s8  ;;  %571 = vrot.lane.b32.xlu0 %v915_v12, %s1237_s8 }
  0xc9   : > { %625 = vrot.lane.b32.xlu1 %v922_v13, %s1237_s8  ;;  %622 = vrot.lane.b32.xlu0 %v922_v13, %s1238_s22 }
  0xcd   : > { %502 = vrot.lane.b32.xlu1 %v906_v14, %s1239_s30  ;;  %500 = vrot.lane.b32.xlu0 %v905_v15, %s1239_s30 }
  0xd1   : > { %508 = vrot.lane.b32.xlu1 %v906_v14, %s1240_s23  ;;  %506 = vrot.lane.b32.xlu0 %v905_v15, %s1240_s23 }
 0x107   : > { %v524_v16 = vpop.permute.xlu1 %523  ;;  %v518_v17 = vpop.permute.xlu0 %517 }
 0x108   : > { %v529_v42 = vsel %vm495_vm0, %v518_v17, %v524_v16 }
 0x109   : > { %v583_v49 = vadd.f32 %v903_v41, %v529_v42 }
 0x10b   : > { %v526_v18 = vpop.permute.xlu1 %525  ;;  %v520_v19 = vpop.permute.xlu0 %519 }
 0x10c   : > { %v530_v40 = vsel %vm495_vm0, %v520_v19, %v526_v18 }
 0x10d   : > { %v584_v46 = vadd.f32 %v904_v39, %v530_v40 }
 0x10f   : > { %v602_v20 = vpop.permute.xlu1 %601  ;;  %v599_v21 = vpop.permute.xlu0 %598 }
 0x110   : > { %v604_v51 = vsel %vm495_vm0, %v599_v21, %v602_v20 }
 0x111   : > { %v629_v63 = vadd.f32 %v917_v50, %v604_v51 }
 0x113   : > { %v536_v22 = vpop.permute.xlu1 %535  ;;  %v534_v23 = vpop.permute.xlu0 %533 }
 0x117   : > { %v542_v24 = vpop.permute.xlu1 %541  ;;  %v540_v25 = vpop.permute.xlu0 %539 }
 0x118   : > { %v546_v45 = vsel %vm512_vm1, %v536_v22, %v542_v24  ;;  %v545_v47 = vsel %vm512_vm1, %v534_v23, %v540_v25  ;;  %v660_v22 = vsub.s32 0, %v1582_v48  ;;  %v444_v25 = vld [vmem:[%s1508_s29 + $0x8] sm:$0xff] }
 0x119   : > { %v586_v52 = vadd.f32 %v584_v46, %v546_v45  ;;  %v594_v53 = vsub.f32 %v530_v40, %v546_v45  ;;  %v585_v56 = vadd.f32 %v583_v49, %v545_v47  ;;  %v593_v57 = vsub.f32 %v529_v42, %v545_v47 }
 0x11b   : > { %v552_v26 = vpop.permute.xlu1 %551  ;;  %v550_v27 = vpop.permute.xlu0 %549  ;;  %v647_v4 = vrot.slane %v586_v52, 7  ;;  %v679_v5 = vrot.slane %v594_v53, 7  ;;  %v651_v10 = vrot.slane %v585_v56, 7  ;;  %v682_v11 = vrot.slane %v593_v57, 7 }
 0x11f   : > { %v558_v28 = vpop.permute.xlu1 %557  ;;  %v556_v29 = vpop.permute.xlu0 %555 }
 0x120   : > { %v562_v59 = vsel %vm512_vm1, %v552_v26, %v558_v28  ;;  %v561_v61 = vsel %vm512_vm1, %v550_v27, %v556_v29  ;;  %v443_v27 = vld [vmem:[%s1508_s29] sm:$0xff] }
 0x121   : > { %v588_v12 = vadd.f32 %v908_v58, %v562_v59  ;;  %v587_v13 = vadd.f32 %v907_v60, %v561_v61 }
 0x123   : > { %v610_v30 = vpop.permute.xlu1 %609  ;;  %v607_v31 = vpop.permute.xlu0 %606 }
 0x124   : > { %v612_v0 = vsel %vm512_vm1, %v607_v31, %v610_v30  ;;  %v655_v31 = vsel %vm650_vm2, %v647_v4, %v651_v10 }
 0x125   : > { %v630_v14 = vadd.f32 %v629_v63, %v612_v0  ;;  %v633_v15 = vsub.f32 %v604_v51, %v612_v0 }
 0x127   : > { %v618_v32 = vpop.permute.xlu1 %617  ;;  %v615_v33 = vpop.permute.xlu0 %614  ;;  %v677_v38 = vrot.slane %v633_v15, %v644_v62 }
 0x128   : > { %v620_v2 = vsel %vm512_vm1, %v615_v33, %v618_v32  ;;  %v686_v32 = vsel %vm650_vm2, %v679_v5, %v682_v11  ;;  %v645_v33 = vrot.slane %v630_v14, %v644_v62 }
 0x129   : > { %v631_v16 = vadd.f32 %v920_v1, %v620_v2  ;;  %v687_v57 = vsel %vm638_vm5, %v677_v38, %v686_v32 }
 0x12a   : > { %v656_v56 = vsel %vm638_vm5, %v645_v33, %v655_v31 }
 0x12b   : > { %v1572_v34 = vpop.permute.xlu1 %485  ;;  %v1574_v35 = vpop.permute.xlu0 %483 }
 0x12f   : > { %v492_v36 = vpop.permute.xlu1 %491  ;;  %v490_v37 = vpop.permute.xlu0 %489 }
 0x130   : > { %v497_v26 = vsel %vm495_vm0, %v1572_v34, %v492_v36  ;;  %v496_v28 = vsel %vm495_vm0, %v1574_v35, %v490_v37  ;;  %v652_v36 = vsel %vm650_vm2, %v651_v10, %v647_v4  ;;  %v683_v35 = vsel %vm650_vm2, %v682_v11, %v679_v5 }
 0x131   : > { %v579_v34 = vadd.f32 %v496_v28, %v443_v27 }
 0x133   : > { %v568_v43 = vpop.permute.xlu1 %567  ;;  %v566_v44 = vpop.permute.xlu0 %565 }
 0x137   : > { %v574_v54 = vpop.permute.xlu1 %573  ;;  %v572_v55 = vpop.permute.xlu0 %571 }
 0x138   : > { %v578_v6 = vsel %vm495_vm0, %v568_v43, %v574_v54  ;;  %v577_v7 = vsel %vm495_vm0, %v566_v44, %v572_v55  ;;  %v580_v43 = vadd.f32 %v497_v26, %v444_v25 }
 0x139   : > { %v590_v18 = vadd.f32 %v588_v12, %v578_v6  ;;  %v596_v19 = vsub.f32 %v578_v6, %v562_v59  ;;  %v589_v20 = vadd.f32 %v587_v13, %v577_v7  ;;  %v595_v21 = vsub.f32 %v577_v7, %v561_v61 }
 0x13b   : > { %v626_v8 = vpop.permute.xlu1 %625  ;;  %v623_v9 = vpop.permute.xlu0 %622  ;;  %v666_v39 = vrot.slane %v590_v18, 1  ;;  %v696_v40 = vrot.slane %v596_v19, 1  ;;  %v665_v41 = vrot.slane %v589_v20, 1  ;;  %v695_v42 = vrot.slane %v595_v21, 1 }
 0x13c   : > { %v628_v17 = vsel %vm495_vm0, %v623_v9, %v626_v8 }
 0x13d   : > { %v632_v29 = vadd.f32 %v631_v16, %v628_v17  ;;  %v634_v30 = vsub.f32 %v628_v17, %v620_v2  ;;  %v671_v54 = vsel %vm664_vm3, %v666_v39, %v665_v41  ;;  %v701_v55 = vsel %vm664_vm3, %v696_v40, %v695_v42 }
 0x13e   : > { %v667_v0 = vsel %vm664_vm3, %v665_v41, %v666_v39  ;;  %v697_v1 = vsel %vm664_vm3, %v695_v42, %v696_v40 }
 0x13f   : > { %v503_v23 = vpop.permute.xlu1 %502  ;;  %v501_v24 = vpop.permute.xlu0 %500  ;;  %v661_v45 = vrot.slane %v632_v29, %v660_v22  ;;  %v692_v46 = vrot.slane %v634_v30, %v660_v22  ;;  %v712_v9 = vsub.f32 %v656_v56, %v667_v0 }
 0x141   : > { %v673_v62 = vsel %vm641_vm4, %v661_v45, %v671_v54  ;;  %v703_v63 = vsel %vm641_vm4, %v692_v46, %v701_v55 }
 0x142   : > { %v713_v3 = vsub.f32 %v652_v36, %v673_v62 }
 0x143   : > { %v509_v37 = vpop.permute.xlu1 %508  ;;  %v507_v44 = vpop.permute.xlu0 %506 }
 0x144   : > { %v514_v47 = vsel %vm512_vm1, %v503_v23, %v509_v37  ;;  %v513_v49 = vsel %vm512_vm1, %v501_v24, %v507_v44 }
 0x145   : > { %v582_v50 = vadd.f32 %v580_v43, %v514_v47  ;;  %v592_v51 = vsub.f32 %v497_v26, %v514_v47  ;;  %v581_v52 = vadd.f32 %v579_v34, %v513_v49  ;;  %v591_v53 = vsub.f32 %v496_v28, %v513_v49 }
 0x147   : > { %v705_v58 = vadd.f32 %v652_v36, %v582_v50  ;;  %v709_v59 = vadd.f32 %v683_v35, %v592_v51  ;;  %v704_v60 = vadd.f32 %v656_v56, %v581_v52  ;;  %v708_v61 = vadd.f32 %v687_v57, %v591_v53 }
 0x149   : > { %v707_v2 = vadd.f32 %v705_v58, %v673_v62  ;;  %v711_v4 = vadd.f32 %v709_v59, %v703_v63  ;;  %v706_v5 = vadd.f32 %v704_v60, %v667_v0  ;;  %v710_v6 = vadd.f32 %v708_v61, %v697_v1 }
 0x14b   : > { %v715_v48 = vmul.f32 %v707_v2, %v707_v2  ;;  %722 = vst.msk [vmem:[%s412_s27 + $0x8] sm:$0xff] %vm720_vm6, %v707_v2  ;;  %924 = vst.msk [vmem:[%s412_s27 + $0x18] sm:$0xff] %vm720_vm6, %v711_v4  ;;  %v714_v7 = vmul.f32 %v706_v5, %v706_v5 }
 0x14c   : > { %721 = vst.msk [vmem:[%s412_s27] sm:$0xff] %vm720_vm6, %v706_v5  ;;  %923 = vst.msk [vmem:[%s412_s27 + $0x10] sm:$0xff] %vm720_vm6, %v710_v6 }
 0x14d   : > { %v717_v8 = vmul.f32 -0.0001, %v715_v48  ;;  %v716_v10 = vmul.f32 -0.0001, %v714_v7 }
 0x14f   : > { %v719_v11 = vadd.f32 %v717_v8, %v713_v3  ;;  %v718_v12 = vadd.f32 %v716_v10, %v712_v9 }
 0x151   : > { %926 = vst.msk [vmem:[%s412_s27 + $0x28] sm:$0xff] %vm720_vm6, %v719_v11  ;;  %925 = vst.msk [vmem:[%s412_s27 + $0x20] sm:$0xff] %vm720_vm6, %v718_v12 }
 0x152   : > { %1151 = shalt.err (!%p1148_p11)
}
 0x153   : > { %s1152_s26 = scalar_lea.hbm %s1636_s6, 768  ;;  %s1156_s1 = scalar_lea.hbm %s1693_s4, 1536 }
 0x154   : > { %p1153_p5 = scmp.ne.s32.totalorder %s1636_s6, %s1152_s26  ;;  %p1157_p0 = scmp.lt.u32.totalorder %s1636_s6, %s1693_s4 }
 0x155   : > { %p1158_p3 = scmp.lt.u32.totalorder %s1156_s1, %s1152_s26  ;;  %p1160_p6 = scmp.lt.u32.totalorder %s1152_s26, %s1636_s6 }
 0x156   : > { %p1154_p10 = pnand %p1153_p5, %p1739_p8 }
 0x157   : > { %p1159_p7 = por %p1158_p3, %p1157_p0 }
 0x158   : > { %p1155_p9 = pneg %p1154_p10 }
 0x159   : > { %p1161_p2 = por %p1160_p6, %p1159_p7 }
 0x15b   : > { %p1162_p12 = pnand %p1161_p2, %p1155_p9 }
 0x15d   : > { %1165 = shalt.err (!%p1162_p12)
}
 0x15e   : > { %s1242_s28 = smov 128   ;;  %s1243_s19 = smov 8  }
 0x15f   : > { %952 = dma.vmem_to_hbm [thread:$0]  (%p1739_p8), %s1638_s21, 768, %s1636_s6, %s730_s25, %s1242_s28, %s1242_s28, %s1243_s19  }
 0x160 PF: > { %s1740_s8 = sld [smem:[#allocation20_spill]]  ;;  %s1741_s22 = sld [smem:[#allocation17_spill]] }
 0x161   : > { %s760_s30 = sand.u32 1, %s1208_s15  }
 0x162   : > { %s761_s23 = scalar_lea.sflag [#allocation4], %s760_s30 }
 0x166   : > { %p1742_p1 = scmp.ne.s32.totalorder %s1740_s8, 0  ;;  %p1743_p4 = scmp.ge.s32.totalorder %s1741_s22, 2 }
 0x168   : > { %p969_p13 = pnand %p1743_p4, %p1742_p1 }
 0x16a   : > { %1203 = dma.done.wait (!%p969_p13), %s761_s23, 768  }
 0x16b   : > { %1205 = vsyncadd (!%p969_p13), %s761_s23, 4294966528  ;;  %s24_s20 = sadd.s32 1, %s1741_s22   ;;  %s1744_s17 = sld [smem:[#allocation15_spill]] }
 0x16c   : > { %p21_p11 = scmp.ge.s32.totalorder %s24_s20, 4   ;;  %s1745_s27 = sld [smem:[#allocation19_spill]] }
 0x16d   : > { %s1746_s18 = sld [smem:[#allocation16_spill]]  ;;  %s1747_s19 = sld [smem:[#allocation18_spill]] }
 0x16e   : > { %s1748_s15 = smov %s1212_s16  ;;  %23 = sbr.rel (!%p21_p11) target bundleno = 12 (0xc), region = 126 }
 0x171   : > { %s1749_s16 = smov %s1744_s17 }
 0x172   : > { %s1750_s17 = smov %s1745_s27 }
 0x175   :  { %766 = vsyncpa [#allocation3], 1 }
 0x176   :  { %768 = vsyncpa [#allocation3 + $0x1], 1 }
 0x177   :  { %769 = vsyncpa [#allocation8], 1 }
 0x178   :  { %771 = vsyncpa [#allocation8 + $0x1], 1 }
 0x179   :  { %772 = vsyncpa [#allocation4], 1 }
 0x17a   :  { %774 = vsyncpa [#allocation4 + $0x1], 1 }
 0x17b   :  { %775 = vsyncpa [#allocation5], 1 }
 0x17c   :  { %777 = vsyncpa [#allocation5 + $0x1], 1 }

</bundles_post_ra>
